<compile_context>
chip_gen: v5e
topology: v5e:2x2
jax: 0.10.0
libtpu: 0.0.40
codegen_flags: <defaults>
</compile_context>

<pallas_src>
import functools

import jax
import jax.numpy as jnp
from jax import lax
from jax.experimental import pallas as pl
from jax.experimental.pallas import tpu as pltpu

LEAKY_SLOPE = 0.01
ATTR_DIMS = [('importance', 0, 8, 5), ('oneway', 1, 2, 2),
             ('tunnel', 2, 2, 2), ('lanes', 3, 6, 3)]   # sum(dim_out) = 12


def _leaky(x):
    return jnp.where(x > 0, x, LEAKY_SLOPE * x)


def _swish(x):
    return x * jax.nn.sigmoid(x)


def _dot(a, b):
    return jnp.dot(a, b, preferred_element_type=jnp.float32)


# ----------------------------- Pallas kernel -------------------------------

def trf_edge_kernel(feat_ref, pcol_ref, src_ref, dst_ref, dstT_ref, invdeg_ref,
                    w_pc, b_pc, w_e1e, w_comb, b_comb,
                    wm1c, bm1, bn_s, bn_b, wm2, bm2, wu1, bu1, wu2, bu2,
                    wp0, bp0, wp1, bp1, wpl, bpl,
                    o_ref, *, num_layers, hh):
    """Fully fused TrfEdgeNet forward (eval).

    Front end (Edge_Attr + embedding_1 with MLP.out folded) -> L unrolled
    GNN_Layer(aggr='mean') passes -> embedding_2 + LinkPredictor, all on
    VMEM-resident data; only O(E) edge-index bytes and O(M) node features
    cross HBM.
    """
    E = src_ref.shape[0]
    M = invdeg_ref.shape[0]

    # ---- front end: Edge_Attr.process_coords (+LeakyReLU) + embedding_1 ----
    #   x0 = p_col * (w_out @ w_e1[:3]) + leaky(feat @ w_pc + b_pc) @ w_e1[3:]
    #        + (b_out @ w_e1[:3] + b_e1)
    ea = _leaky(_dot(feat_ref[...], w_pc[...]) + b_pc[...])              # (M, 64)
    x = pcol_ref[...] * w_comb[...] + _dot(ea, w_e1e[...]) + b_comb[...]  # (M, hh)

    # ---- gather/scatter one-hots: built ONCE, 1/deg folded into scatter ----
    colM = lax.broadcasted_iota(jnp.int32, (E, M), 1)
    g_dst = (colM == dst_ref[...]).astype(jnp.float32)                  # (E, M) -> x_i
    g_src = (colM == src_ref[...]).astype(jnp.float32)                  # (E, M) -> x_j
    rowM = lax.broadcasted_iota(jnp.int32, (M, E), 0)
    scat = (rowM == dstT_ref[...]).astype(jnp.float32) * invdeg_ref[...]  # (M, E)

    # ---- GNN layers, Python-unrolled (static, small L) ----------------------
    for l in range(num_layers):
        # message net first Linear: concat(x_i, x_j) @ Wm1
        #   == g_dst @ (x @ Wi) + g_src @ (x @ Wj)
        # computed with one fat N=2*hh projection + two gather matmuls.
        xc = _dot(x, wm1c[l])                                           # (M, 2hh)
        h = _dot(g_dst, xc[:, :hh]) + _dot(g_src, xc[:, hh:]) + bm1[l]  # (E, hh)
        h = _swish(h)
        h = h * bn_s[l] + bn_b[l]                  # BatchNorm1d (eval), folded
        m = _swish(_dot(h, wm2[l]) + bm2[l])                            # (E, hh)
        agg = _dot(scat, m)                                             # (M, hh) mean
        # update net: single fattened K=2*hh matmul on concat([x, agg])
        xa = jnp.concatenate([x, agg], axis=1)                          # (M, 2hh)
        u = _swish(_dot(xa, wu1[l]) + bu1[l])
        u = _swish(_dot(u, wu2[l]) + bu2[l])
        x = x + u

    # ---- embedding_2 + LinkPredictor (eval: dropout = identity) ------------
    # embedding_2 folded into the three branches' fattened first Linear; the
    # result is a single lane-dense (M, 128) slab split in the wrapper.
    hp = _dot(x, wp0[...]) + bp0[...]                                   # (M, 3H)
    hp = hp + _leaky(hp)
    hp = _dot(hp, wp1[...]) + bp1[...]            # block-diagonal (3H, 3H)
    hp = hp + _leaky(hp)
    o_ref[...] = _dot(hp, wpl[...]) + bpl[...]    # (M, 128), cols >= 7 are zero


def _vmem_spec():
    return pl.BlockSpec(memory_space=pltpu.MemorySpace.VMEM)


# ----------------------------- parameters ----------------------------------

def _linear(key, fan_in, fan_out):
    kw, kb = jax.random.split(key)
    bound = 1.0 / (fan_in ** 0.5)
    w = jax.random.uniform(kw, (fan_in, fan_out), jnp.float32, -bound, bound)
    b = jax.random.uniform(kb, (1, fan_out), jnp.float32, -bound, bound)
    return w, b


def init_params(key, counters, n_edges, hidden_dim=64, trf_num_layers=2,
                mlp_num_layers=3, num_edge_classes=3):
    hh = hidden_dim // 2                         # 32
    keys = iter(jax.random.split(key, 64))
    p = {}
    # Edge_Attr: embeddings + Linear(21, 64)
    p['emb'] = {name: jax.random.normal(next(keys), (din, dout), jnp.float32)
                for name, _, din, dout in ATTR_DIMS}
    p['w_pc'], p['b_pc'] = _linear(next(keys), 21, 64)
    # MLP (counters -> counters -> n_edges -> Linear(1,3))
    p['w_h1'], p['b_h1'] = _linear(next(keys), counters, counters)
    p['w_h2'], p['b_h2'] = _linear(next(keys), counters, counters)
    p['w_pred'], p['b_pred'] = _linear(next(keys), counters, n_edges)
    p['w_out'], p['b_out'] = _linear(next(keys), 1, 3)
    # embedding_1 (hidden_dim + 3 -> hidden_dim//2), embedding_2
    p['w_e1'], p['b_e1'] = _linear(next(keys), hidden_dim + 3, hh)
    p['w_e2'], p['b_e2'] = _linear(next(keys), hh, hidden_dim)
    # GNN layers
    p['gnn'] = []
    for _ in range(trf_num_layers):
        g = {}
        g['wm1'], g['bm1'] = _linear(next(keys), 2 * hh, hh)
        g['wm2'], g['bm2'] = _linear(next(keys), hh, hh)
        g['wu1'], g['bu1'] = _linear(next(keys), 2 * hh, hh)
        g['wu2'], g['bu2'] = _linear(next(keys), hh, hh)
        g['bn_gamma'] = jnp.ones((1, hh), jnp.float32)   # PyTorch BN defaults
        g['bn_beta'] = jnp.zeros((1, hh), jnp.float32)
        g['bn_mean'] = jnp.zeros((1, hh), jnp.float32)
        g['bn_var'] = jnp.ones((1, hh), jnp.float32)
        p['gnn'].append(g)

    def branch(out_dim):
        ws = [_linear(next(keys), hidden_dim, hidden_dim)]
        for _ in range(mlp_num_layers - 2):
            ws.append(_linear(next(keys), hidden_dim, hidden_dim))
        ws.append(_linear(next(keys), hidden_dim, out_dim))
        return ws

    p['lins'] = branch(num_edge_classes)
    p['lins1'] = branch(1)
    p['lins2'] = branch(num_edge_classes)
    return p


# ----------------------------- forward -------------------------------------

def trf_edge_net_forward(params, data, edge_index):
    num_attr, cc_attr = data['num_attr'], data['cc_attr']
    y_init, x_in = data['y_init'], data['x']
    b, n, _ = num_attr.shape
    M = b * n
    E = edge_index.shape[1]
    hh = params['w_e1'].shape[1]          # 32
    H = params['w_e2'].shape[1]           # 64

    # ---- glue: embedding lookups + feature concat (data-dependent gather) --
    embs = [jnp.take(params['emb'][name], cc_attr[:, :, i], axis=0)
            for name, i, _, _ in ATTR_DIMS]
    feat = jnp.concatenate(embs + [num_attr, y_init], axis=-1)
    feat = feat.reshape(M, -1).astype(jnp.float32)                    # (M, 21)

    # ---- tiny per-batch MLP, computed ONCE on (b, counters) (no n-fold
    #      replication, no (M, n) selector); MLP.out folded below -----------
    h = jax.nn.relu(x_in @ params['w_h1'] + params['b_h1'][0])
    h = jax.nn.relu(h @ params['w_h2'] + params['b_h2'][0])
    pr = h @ params['w_pred'] + params['b_pred'][0]                   # (b, n)
    p_col = pr.reshape(M, 1).astype(jnp.float32)                      # (M, 1)

    # ---- algebraic fold: MLP.out (Linear(1,3)) into embedding_1 ------------
    we1m, we1e = params['w_e1'][:3], params['w_e1'][3:]
    w_comb = params['w_out'] @ we1m                       # (1, hh)
    b_comb = params['b_out'] @ we1m + params['b_e1']      # (1, hh)

    # ---- edge index / degree glue (O(E + M); no dense one-hot in HBM) ------
    src = edge_index[0].astype(jnp.int32)
    dst = edge_index[1].astype(jnp.int32)
    src_e1 = src.reshape(E, 1)
    dst_e1 = dst.reshape(E, 1)
    dst_1e = dst.reshape(1, E)
    deg = jnp.zeros((M,), jnp.float32).at[dst].add(1.0)
    invdeg = (1.0 / jnp.maximum(deg, 1.0)).reshape(M, 1)

    # ---- per-layer GNN weights, stacked; indexed with static ints in-kernel -
    gs = params['gnn']
    L = len(gs)
    eps = 1e-5
    bn_scale = [g['bn_gamma'] / jnp.sqrt(g['bn_var'] + eps) for g in gs]
    wm1c = jnp.stack([jnp.concatenate([g['wm1'][:hh], g['wm1'][hh:]], axis=1)
                      for g in gs])                       # (L, hh, 2hh) fattened
    bm1 = jnp.stack([g['bm1'] for g in gs])
    bn_s = jnp.stack(bn_scale)
    bn_b = jnp.stack([g['bn_beta'] - g['bn_mean'] * s
                      for g, s in zip(gs, bn_scale)])
    wm2 = jnp.stack([g['wm2'] for g in gs])
    bm2 = jnp.stack([g['bm2'] for g in gs])
    wu1 = jnp.stack([g['wu1'] for g in gs])
    bu1 = jnp.stack([g['bu1'] for g in gs])
    wu2 = jnp.stack([g['wu2'] for g in gs])
    bu2 = jnp.stack([g['bu2'] for g in gs])

    # ---- predictor: fold embedding_2 into the fattened first layer ---------
    (w0a, b0a), (w1a, b1a), (wla, bla) = params['lins']
    (w0b, b0b), (w1b, b1b), (wlb, blb) = params['lins1']
    (w0c, b0c), (w1c, b1c), (wlc, blc) = params['lins2']
    W0 = jnp.concatenate([w0a, w0b, w0c], axis=1)          # (H, 3H)
    B0 = jnp.concatenate([b0a, b0b, b0c], axis=1)          # (1, 3H)
    wp0 = params['w_e2'] @ W0                              # (hh, 3H)
    bp0 = params['b_e2'] @ W0 + B0                         # (1, 3H)
    wp1 = jnp.zeros((3 * H, 3 * H), jnp.float32)
    wp1 = (wp1.at[0:H, 0:H].set(w1a)
              .at[H:2 * H, H:2 * H].set(w1b)
              .at[2 * H:, 2 * H:].set(w1c))
    bp1 = jnp.concatenate([b1a, b1b, b1c], axis=1)
    oa, ob, oc = wla.shape[1], wlb.shape[1], wlc.shape[1]  # 3, 1, 3
    OUT = 128                                              # lane-dense output slab
    wpl = jnp.zeros((3 * H, OUT), jnp.float32)
    wpl = (wpl.at[0:H, 0:oa].set(wla)
              .at[H:2 * H, oa:oa + ob].set(wlb)
              .at[2 * H:, oa + ob:oa + ob + oc].set(wlc))
    bpl = jnp.zeros((1, OUT), jnp.float32)
    bpl = (bpl.at[:, 0:oa].set(bla)
              .at[:, oa:oa + ob].set(blb)
              .at[:, oa + ob:oa + ob + oc].set(blc))

    kernel = functools.partial(trf_edge_kernel, num_layers=L, hh=hh)
    num_inputs = 27
    pred = pl.pallas_call(
        kernel,
        out_shape=jax.ShapeDtypeStruct((M, OUT), jnp.float32),
        in_specs=[_vmem_spec() for _ in range(num_inputs)],
        out_specs=_vmem_spec(),
        compiler_params=pltpu.CompilerParams(
            vmem_limit_bytes=32 * 1024 * 1024),   # v5e scoped default is 16 MiB
    )(feat, p_col, src_e1, dst_e1, dst_1e, invdeg,
      params['w_pc'], params['b_pc'], we1e, w_comb, b_comb,
      wm1c, bm1, bn_s, bn_b, wm2, bm2, wu1, bu1, wu2, bu2,
      wp0, bp0, wp1, bp1, wpl, bpl)

    o0 = pred[:, 0:oa].reshape(b, n, oa)
    o1 = pred[:, oa:oa + ob].reshape(b, n, ob)
    o2 = pred[:, oa + ob:oa + ob + oc].reshape(b, n, oc)
    return o0, o1, o2


# ----------------------------- pure-JAX reference ---------------------------

def reference_forward(params, data, edge_index):
    num_attr, cc_attr = data['num_attr'], data['cc_attr']
    y_init, x_in = data['y_init'], data['x']
    b, n, _ = num_attr.shape
    M = b * n
    embs = [jnp.take(params['emb'][name], cc_attr[:, :, i], axis=0)
            for name, i, _, _ in ATTR_DIMS]
    feat = jnp.concatenate(embs + [num_attr, y_init], axis=-1)
    ea = _leaky(feat @ params['w_pc'] + params['b_pc'][0])
    h = jax.nn.relu(x_in @ params['w_h1'] + params['b_h1'][0])
    h = jax.nn.relu(h @ params['w_h2'] + params['b_h2'][0])
    pr = h @ params['w_pred'] + params['b_pred'][0]
    mlp_out = pr[..., None] * params['w_out'][0] + params['b_out'][0]
    x = jnp.concatenate([mlp_out, ea], axis=-1)
    x = (x @ params['w_e1'] + params['b_e1'][0]).reshape(M, -1)
    src, dst = edge_index[0], edge_index[1]
    for g in params['gnn']:
        xi, xj = x[dst], x[src]
        h1 = jnp.concatenate([xi, xj], -1) @ g['wm1'] + g['bm1'][0]
        h1 = h1 * jax.nn.sigmoid(h1)
        h1 = ((h1 - g['bn_mean'][0]) / jnp.sqrt(g['bn_var'][0] + 1e-5)
              * g['bn_gamma'][0] + g['bn_beta'][0])
        m = h1 @ g['wm2'] + g['bm2'][0]
        m = m * jax.nn.sigmoid(m)
        aggv = jnp.zeros((M, m.shape[-1]), jnp.float32).at[dst].add(m)
        deg = jnp.zeros((M,), jnp.float32).at[dst].add(1.0)
        aggv = aggv / jnp.maximum(deg, 1.0)[:, None]
        u = jnp.concatenate([x, aggv], -1) @ g['wu1'] + g['bu1'][0]
        u = u * jax.nn.sigmoid(u)
        u = u @ g['wu2'] + g['bu2'][0]
        u = u * jax.nn.sigmoid(u)
        x = x + u
    x = (x @ params['w_e2'] + params['b_e2'][0]).reshape(b, n, -1)

    def branch(xb, ws):
        for w, bb in ws[:-1]:
            xb = xb @ w + bb[0]
            xb = xb + _leaky(xb)
        w, bb = ws[-1]
        return xb @ w + bb[0]

    return (branch(x, params['lins']), branch(x, params['lins1']),
            branch(x, params['lins2']))


# ----------------------------- main -----------------------------------------

if __name__ == "__main__":
    key = jax.random.PRNGKey(0)
    b, n, counters, E = 2, 8, 16, 12          # n == city_attr['edges']
    kd = jax.random.split(key, 9)
    params = init_params(kd[0], counters, n, hidden_dim=64,
                         trf_num_layers=2, mlp_num_layers=3, num_edge_classes=3)
    num_attr = jax.random.normal(kd[1], (b, n, 8), jnp.float32)
    y_init = jax.random.normal(kd[2], (b, n, 1), jnp.float32)
    cc_attr = jnp.stack([
        jax.random.randint(kd[3], (b, n), 0, 8),
        jax.random.randint(kd[4], (b, n), 0, 2),
        jax.random.randint(kd[5], (b, n), 0, 2),
        jax.random.randint(kd[6], (b, n), 0, 6),
    ], axis=-1).astype(jnp.int32)
    x_in = jax.random.normal(kd[7], (b, counters), jnp.float32)
    edge_index = jax.random.randint(kd[8], (2, E), 0, b * n, jnp.int32)
    data = {'num_attr': num_attr, 'cc_attr': cc_attr, 'y_init': y_init, 'x': x_in}

    outs = jax.block_until_ready(trf_edge_net_forward(params, data, edge_index))
    refs = reference_forward(params, data, edge_index)
    for o, r in zip(outs, refs):
        assert o.shape == r.shape, (o.shape, r.shape)
        assert jnp.allclose(o, r, atol=2e-3, rtol=2e-3), \
            float(jnp.max(jnp.abs(o - r)))
    print("KERNEL_OK")
</pallas_src>

<mosaic_0001>
module attributes {stable_mosaic.version = 11 : i64} {
  func.func @trf_edge_kernel(%arg0: memref<16x21xf32, #tpu.memory_space<vmem>>, %arg1: memref<16x1xf32, #tpu.memory_space<vmem>>, %arg2: memref<12x1xi32, #tpu.memory_space<vmem>>, %arg3: memref<12x1xi32, #tpu.memory_space<vmem>>, %arg4: memref<1x12xi32, #tpu.memory_space<vmem>>, %arg5: memref<16x1xf32, #tpu.memory_space<vmem>>, %arg6: memref<21x64xf32, #tpu.memory_space<vmem>>, %arg7: memref<1x64xf32, #tpu.memory_space<vmem>>, %arg8: memref<64x32xf32, #tpu.memory_space<vmem>>, %arg9: memref<1x32xf32, #tpu.memory_space<vmem>>, %arg10: memref<1x32xf32, #tpu.memory_space<vmem>>, %arg11: memref<2x32x64xf32, #tpu.memory_space<vmem>>, %arg12: memref<2x1x32xf32, #tpu.memory_space<vmem>>, %arg13: memref<2x1x32xf32, #tpu.memory_space<vmem>>, %arg14: memref<2x1x32xf32, #tpu.memory_space<vmem>>, %arg15: memref<2x32x32xf32, #tpu.memory_space<vmem>>, %arg16: memref<2x1x32xf32, #tpu.memory_space<vmem>>, %arg17: memref<2x64x32xf32, #tpu.memory_space<vmem>>, %arg18: memref<2x1x32xf32, #tpu.memory_space<vmem>>, %arg19: memref<2x32x32xf32, #tpu.memory_space<vmem>>, %arg20: memref<2x1x32xf32, #tpu.memory_space<vmem>>, %arg21: memref<32x192xf32, #tpu.memory_space<vmem>>, %arg22: memref<1x192xf32, #tpu.memory_space<vmem>>, %arg23: memref<192x192xf32, #tpu.memory_space<vmem>>, %arg24: memref<1x192xf32, #tpu.memory_space<vmem>>, %arg25: memref<192x128xf32, #tpu.memory_space<vmem>>, %arg26: memref<1x128xf32, #tpu.memory_space<vmem>>, %arg27: memref<16x128xf32, #tpu.memory_space<vmem>>) attributes {dimension_semantics = [], scalar_prefetch = 0 : i64, scratch_operands = 0 : i64, tpu.core_type = #tpu.core_type<tc>} {
    %c0 = arith.constant 0 : index
    %c0_0 = arith.constant 0 : index
    %0 = vector.load %arg0[%c0, %c0_0] : memref<16x21xf32, #tpu.memory_space<vmem>>, vector<16x21xf32>
    %c0_1 = arith.constant 0 : index
    %c0_2 = arith.constant 0 : index
    %1 = vector.load %arg6[%c0_1, %c0_2] : memref<21x64xf32, #tpu.memory_space<vmem>>, vector<21x64xf32>
    %cst = arith.constant dense<0.000000e+00> : vector<16x64xf32>
    %2 = tpu.matmul %0, %1, %cst {dimension_numbers = #tpu.dot_dimension_numbers<[1], [0], [0], [1], [0, 0, 1, 1], [], []>} : vector<16x21xf32>, vector<21x64xf32>, vector<16x64xf32> -> vector<16x64xf32>
    %c0_3 = arith.constant 0 : index
    %c0_4 = arith.constant 0 : index
    %3 = vector.load %arg7[%c0_3, %c0_4] : memref<1x64xf32, #tpu.memory_space<vmem>>, vector<1x64xf32>
    %4 = vector.broadcast %3 : vector<1x64xf32> to vector<16x64xf32>
    %5 = arith.addf %2, %4 : vector<16x64xf32>
    %cst_5 = arith.constant 0.000000e+00 : f32
    %6 = vector.broadcast %cst_5 : f32 to vector<16x64xf32>
    %7 = arith.cmpf ogt, %5, %6 : vector<16x64xf32>
    %cst_6 = arith.constant 0.00999999977 : f32
    %8 = vector.broadcast %cst_6 : f32 to vector<16x64xf32>
    %9 = arith.mulf %8, %5 : vector<16x64xf32>
    %10 = arith.select %7, %5, %9 : vector<16x64xi1>, vector<16x64xf32>
    %c0_7 = arith.constant 0 : index
    %c0_8 = arith.constant 0 : index
    %11 = vector.load %arg1[%c0_7, %c0_8] : memref<16x1xf32, #tpu.memory_space<vmem>>, vector<16x1xf32>
    %c0_9 = arith.constant 0 : index
    %c0_10 = arith.constant 0 : index
    %12 = vector.load %arg9[%c0_9, %c0_10] : memref<1x32xf32, #tpu.memory_space<vmem>>, vector<1x32xf32>
    %13 = vector.broadcast %11 : vector<16x1xf32> to vector<16x32xf32>
    %14 = vector.broadcast %12 : vector<1x32xf32> to vector<16x32xf32>
    %15 = arith.mulf %13, %14 : vector<16x32xf32>
    %c0_11 = arith.constant 0 : index
    %c0_12 = arith.constant 0 : index
    %16 = vector.load %arg8[%c0_11, %c0_12] : memref<64x32xf32, #tpu.memory_space<vmem>>, vector<64x32xf32>
    %cst_13 = arith.constant dense<0.000000e+00> : vector<16x32xf32>
    %17 = tpu.matmul %10, %16, %cst_13 {dimension_numbers = #tpu.dot_dimension_numbers<[1], [0], [0], [1], [0, 0, 1, 1], [], []>} : vector<16x64xf32>, vector<64x32xf32>, vector<16x32xf32> -> vector<16x32xf32>
    %18 = arith.addf %15, %17 : vector<16x32xf32>
    %c0_14 = arith.constant 0 : index
    %c0_15 = arith.constant 0 : index
    %19 = vector.load %arg10[%c0_14, %c0_15] : memref<1x32xf32, #tpu.memory_space<vmem>>, vector<1x32xf32>
    %20 = vector.broadcast %19 : vector<1x32xf32> to vector<16x32xf32>
    %21 = arith.addf %18, %20 : vector<16x32xf32>
    %22 = tpu.iota {dimensions = array<i32: 1>} : vector<12x16xi32>
    %c0_16 = arith.constant 0 : index
    %c0_17 = arith.constant 0 : index
    %23 = vector.load %arg3[%c0_16, %c0_17] : memref<12x1xi32, #tpu.memory_space<vmem>>, vector<12x1xi32>
    %24 = vector.broadcast %23 : vector<12x1xi32> to vector<12x16xi32>
    %25 = arith.cmpi eq, %22, %24 : vector<12x16xi32>
    %26 = arith.extui %25 : vector<12x16xi1> to vector<12x16xi32>
    %27 = arith.sitofp %26 : vector<12x16xi32> to vector<12x16xf32>
    %c0_18 = arith.constant 0 : index
    %c0_19 = arith.constant 0 : index
    %28 = vector.load %arg2[%c0_18, %c0_19] : memref<12x1xi32, #tpu.memory_space<vmem>>, vector<12x1xi32>
    %29 = vector.broadcast %28 : vector<12x1xi32> to vector<12x16xi32>
    %30 = arith.cmpi eq, %22, %29 : vector<12x16xi32>
    %31 = arith.extui %30 : vector<12x16xi1> to vector<12x16xi32>
    %32 = arith.sitofp %31 : vector<12x16xi32> to vector<12x16xf32>
    %33 = tpu.iota {dimensions = array<i32: 0>} : vector<16x12xi32>
    %c0_20 = arith.constant 0 : index
    %c0_21 = arith.constant 0 : index
    %34 = vector.load %arg4[%c0_20, %c0_21] : memref<1x12xi32, #tpu.memory_space<vmem>>, vector<1x12xi32>
    %35 = vector.broadcast %34 : vector<1x12xi32> to vector<16x12xi32>
    %36 = arith.cmpi eq, %33, %35 : vector<16x12xi32>
    %37 = arith.extui %36 : vector<16x12xi1> to vector<16x12xi32>
    %38 = arith.sitofp %37 : vector<16x12xi32> to vector<16x12xf32>
    %c0_22 = arith.constant 0 : index
    %c0_23 = arith.constant 0 : index
    %39 = vector.load %arg5[%c0_22, %c0_23] : memref<16x1xf32, #tpu.memory_space<vmem>>, vector<16x1xf32>
    %40 = vector.broadcast %39 : vector<16x1xf32> to vector<16x12xf32>
    %41 = arith.mulf %38, %40 : vector<16x12xf32>
    %c0_24 = arith.constant 0 : index
    %c0_25 = arith.constant 0 : index
    %c0_26 = arith.constant 0 : index
    %42 = vector.load %arg11[%c0_24, %c0_25, %c0_26] : memref<2x32x64xf32, #tpu.memory_space<vmem>>, vector<1x32x64xf32>
    %43 = vector.shape_cast %42 : vector<1x32x64xf32> to vector<32x64xf32>
    %cst_27 = arith.constant dense<0.000000e+00> : vector<16x64xf32>
    %44 = tpu.matmul %21, %43, %cst_27 {dimension_numbers = #tpu.dot_dimension_numbers<[1], [0], [0], [1], [0, 0, 1, 1], [], []>} : vector<16x32xf32>, vector<32x64xf32>, vector<16x64xf32> -> vector<16x64xf32>
    %45 = vector.extract_strided_slice %44 {offsets = [0, 0], sizes = [16, 32], strides = [1, 1]} : vector<16x64xf32> to vector<16x32xf32>
    %cst_28 = arith.constant dense<0.000000e+00> : vector<12x32xf32>
    %46 = tpu.matmul %27, %45, %cst_28 {dimension_numbers = #tpu.dot_dimension_numbers<[1], [0], [0], [1], [0, 0, 1, 1], [], []>} : vector<12x16xf32>, vector<16x32xf32>, vector<12x32xf32> -> vector<12x32xf32>
    %47 = vector.extract_strided_slice %44 {offsets = [0, 32], sizes = [16, 32], strides = [1, 1]} : vector<16x64xf32> to vector<16x32xf32>
    %cst_29 = arith.constant dense<0.000000e+00> : vector<12x32xf32>
    %48 = tpu.matmul %32, %47, %cst_29 {dimension_numbers = #tpu.dot_dimension_numbers<[1], [0], [0], [1], [0, 0, 1, 1], [], []>} : vector<12x16xf32>, vector<16x32xf32>, vector<12x32xf32> -> vector<12x32xf32>
    %49 = arith.addf %46, %48 : vector<12x32xf32>
    %c0_30 = arith.constant 0 : index
    %c0_31 = arith.constant 0 : index
    %c0_32 = arith.constant 0 : index
    %50 = vector.load %arg12[%c0_30, %c0_31, %c0_32] : memref<2x1x32xf32, #tpu.memory_space<vmem>>, vector<1x1x32xf32>
    %51 = vector.shape_cast %50 : vector<1x1x32xf32> to vector<1x32xf32>
    %52 = vector.broadcast %51 : vector<1x32xf32> to vector<12x32xf32>
    %53 = arith.addf %49, %52 : vector<12x32xf32>
    %54 = arith.negf %53 : vector<12x32xf32>
    %55 = math.exp %54 : vector<12x32xf32>
    %cst_33 = arith.constant 1.000000e+00 : f32
    %56 = vector.broadcast %cst_33 : f32 to vector<12x32xf32>
    %57 = arith.addf %56, %55 : vector<12x32xf32>
    %58 = arith.divf %56, %57 : vector<12x32xf32>
    %59 = arith.mulf %53, %58 : vector<12x32xf32>
    %c0_34 = arith.constant 0 : index
    %c0_35 = arith.constant 0 : index
    %c0_36 = arith.constant 0 : index
    %60 = vector.load %arg13[%c0_34, %c0_35, %c0_36] : memref<2x1x32xf32, #tpu.memory_space<vmem>>, vector<1x1x32xf32>
    %61 = vector.shape_cast %60 : vector<1x1x32xf32> to vector<1x32xf32>
    %62 = vector.broadcast %61 : vector<1x32xf32> to vector<12x32xf32>
    %63 = arith.mulf %59, %62 : vector<12x32xf32>
    %c0_37 = arith.constant 0 : index
    %c0_38 = arith.constant 0 : index
    %c0_39 = arith.constant 0 : index
    %64 = vector.load %arg14[%c0_37, %c0_38, %c0_39] : memref<2x1x32xf32, #tpu.memory_space<vmem>>, vector<1x1x32xf32>
    %65 = vector.shape_cast %64 : vector<1x1x32xf32> to vector<1x32xf32>
    %66 = vector.broadcast %65 : vector<1x32xf32> to vector<12x32xf32>
    %67 = arith.addf %63, %66 : vector<12x32xf32>
    %c0_40 = arith.constant 0 : index
    %c0_41 = arith.constant 0 : index
    %c0_42 = arith.constant 0 : index
    %68 = vector.load %arg15[%c0_40, %c0_41, %c0_42] : memref<2x32x32xf32, #tpu.memory_space<vmem>>, vector<1x32x32xf32>
    %69 = vector.shape_cast %68 : vector<1x32x32xf32> to vector<32x32xf32>
    %cst_43 = arith.constant dense<0.000000e+00> : vector<12x32xf32>
    %70 = tpu.matmul %67, %69, %cst_43 {dimension_numbers = #tpu.dot_dimension_numbers<[1], [0], [0], [1], [0, 0, 1, 1], [], []>} : vector<12x32xf32>, vector<32x32xf32>, vector<12x32xf32> -> vector<12x32xf32>
    %c0_44 = arith.constant 0 : index
    %c0_45 = arith.constant 0 : index
    %c0_46 = arith.constant 0 : index
    %71 = vector.load %arg16[%c0_44, %c0_45, %c0_46] : memref<2x1x32xf32, #tpu.memory_space<vmem>>, vector<1x1x32xf32>
    %72 = vector.shape_cast %71 : vector<1x1x32xf32> to vector<1x32xf32>
    %73 = vector.broadcast %72 : vector<1x32xf32> to vector<12x32xf32>
    %74 = arith.addf %70, %73 : vector<12x32xf32>
    %75 = arith.negf %74 : vector<12x32xf32>
    %76 = math.exp %75 : vector<12x32xf32>
    %cst_47 = arith.constant 1.000000e+00 : f32
    %77 = vector.broadcast %cst_47 : f32 to vector<12x32xf32>
    %78 = arith.addf %77, %76 : vector<12x32xf32>
    %79 = arith.divf %77, %78 : vector<12x32xf32>
    %80 = arith.mulf %74, %79 : vector<12x32xf32>
    %cst_48 = arith.constant dense<0.000000e+00> : vector<16x32xf32>
    %81 = tpu.matmul %41, %80, %cst_48 {dimension_numbers = #tpu.dot_dimension_numbers<[1], [0], [0], [1], [0, 0, 1, 1], [], []>} : vector<16x12xf32>, vector<12x32xf32>, vector<16x32xf32> -> vector<16x32xf32>
    %82 = tpu.concatenate %21, %81 in 1 : vector<16x32xf32>, vector<16x32xf32> -> vector<16x64xf32>
    %c0_49 = arith.constant 0 : index
    %c0_50 = arith.constant 0 : index
    %c0_51 = arith.constant 0 : index
    %83 = vector.load %arg17[%c0_49, %c0_50, %c0_51] : memref<2x64x32xf32, #tpu.memory_space<vmem>>, vector<1x64x32xf32>
    %84 = vector.shape_cast %83 : vector<1x64x32xf32> to vector<64x32xf32>
    %cst_52 = arith.constant dense<0.000000e+00> : vector<16x32xf32>
    %85 = tpu.matmul %82, %84, %cst_52 {dimension_numbers = #tpu.dot_dimension_numbers<[1], [0], [0], [1], [0, 0, 1, 1], [], []>} : vector<16x64xf32>, vector<64x32xf32>, vector<16x32xf32> -> vector<16x32xf32>
    %c0_53 = arith.constant 0 : index
    %c0_54 = arith.constant 0 : index
    %c0_55 = arith.constant 0 : index
    %86 = vector.load %arg18[%c0_53, %c0_54, %c0_55] : memref<2x1x32xf32, #tpu.memory_space<vmem>>, vector<1x1x32xf32>
    %87 = vector.shape_cast %86 : vector<1x1x32xf32> to vector<1x32xf32>
    %88 = vector.broadcast %87 : vector<1x32xf32> to vector<16x32xf32>
    %89 = arith.addf %85, %88 : vector<16x32xf32>
    %90 = arith.negf %89 : vector<16x32xf32>
    %91 = math.exp %90 : vector<16x32xf32>
    %cst_56 = arith.constant 1.000000e+00 : f32
    %92 = vector.broadcast %cst_56 : f32 to vector<16x32xf32>
    %93 = arith.addf %92, %91 : vector<16x32xf32>
    %94 = arith.divf %92, %93 : vector<16x32xf32>
    %95 = arith.mulf %89, %94 : vector<16x32xf32>
    %c0_57 = arith.constant 0 : index
    %c0_58 = arith.constant 0 : index
    %c0_59 = arith.constant 0 : index
    %96 = vector.load %arg19[%c0_57, %c0_58, %c0_59] : memref<2x32x32xf32, #tpu.memory_space<vmem>>, vector<1x32x32xf32>
    %97 = vector.shape_cast %96 : vector<1x32x32xf32> to vector<32x32xf32>
    %cst_60 = arith.constant dense<0.000000e+00> : vector<16x32xf32>
    %98 = tpu.matmul %95, %97, %cst_60 {dimension_numbers = #tpu.dot_dimension_numbers<[1], [0], [0], [1], [0, 0, 1, 1], [], []>} : vector<16x32xf32>, vector<32x32xf32>, vector<16x32xf32> -> vector<16x32xf32>
    %c0_61 = arith.constant 0 : index
    %c0_62 = arith.constant 0 : index
    %c0_63 = arith.constant 0 : index
    %99 = vector.load %arg20[%c0_61, %c0_62, %c0_63] : memref<2x1x32xf32, #tpu.memory_space<vmem>>, vector<1x1x32xf32>
    %100 = vector.shape_cast %99 : vector<1x1x32xf32> to vector<1x32xf32>
    %101 = vector.broadcast %100 : vector<1x32xf32> to vector<16x32xf32>
    %102 = arith.addf %98, %101 : vector<16x32xf32>
    %103 = arith.negf %102 : vector<16x32xf32>
    %104 = math.exp %103 : vector<16x32xf32>
    %cst_64 = arith.constant 1.000000e+00 : f32
    %105 = vector.broadcast %cst_64 : f32 to vector<16x32xf32>
    %106 = arith.addf %105, %104 : vector<16x32xf32>
    %107 = arith.divf %105, %106 : vector<16x32xf32>
    %108 = arith.mulf %102, %107 : vector<16x32xf32>
    %109 = arith.addf %21, %108 : vector<16x32xf32>
    %c1 = arith.constant 1 : index
    %c0_65 = arith.constant 0 : index
    %c0_66 = arith.constant 0 : index
    %110 = vector.load %arg11[%c1, %c0_65, %c0_66] : memref<2x32x64xf32, #tpu.memory_space<vmem>>, vector<1x32x64xf32>
    %111 = vector.shape_cast %110 : vector<1x32x64xf32> to vector<32x64xf32>
    %cst_67 = arith.constant dense<0.000000e+00> : vector<16x64xf32>
    %112 = tpu.matmul %109, %111, %cst_67 {dimension_numbers = #tpu.dot_dimension_numbers<[1], [0], [0], [1], [0, 0, 1, 1], [], []>} : vector<16x32xf32>, vector<32x64xf32>, vector<16x64xf32> -> vector<16x64xf32>
    %113 = vector.extract_strided_slice %112 {offsets = [0, 0], sizes = [16, 32], strides = [1, 1]} : vector<16x64xf32> to vector<16x32xf32>
    %cst_68 = arith.constant dense<0.000000e+00> : vector<12x32xf32>
    %114 = tpu.matmul %27, %113, %cst_68 {dimension_numbers = #tpu.dot_dimension_numbers<[1], [0], [0], [1], [0, 0, 1, 1], [], []>} : vector<12x16xf32>, vector<16x32xf32>, vector<12x32xf32> -> vector<12x32xf32>
    %115 = vector.extract_strided_slice %112 {offsets = [0, 32], sizes = [16, 32], strides = [1, 1]} : vector<16x64xf32> to vector<16x32xf32>
    %cst_69 = arith.constant dense<0.000000e+00> : vector<12x32xf32>
    %116 = tpu.matmul %32, %115, %cst_69 {dimension_numbers = #tpu.dot_dimension_numbers<[1], [0], [0], [1], [0, 0, 1, 1], [], []>} : vector<12x16xf32>, vector<16x32xf32>, vector<12x32xf32> -> vector<12x32xf32>
    %117 = arith.addf %114, %116 : vector<12x32xf32>
    %c1_70 = arith.constant 1 : index
    %c0_71 = arith.constant 0 : index
    %c0_72 = arith.constant 0 : index
    %118 = vector.load %arg12[%c1_70, %c0_71, %c0_72] : memref<2x1x32xf32, #tpu.memory_space<vmem>>, vector<1x1x32xf32>
    %119 = vector.shape_cast %118 : vector<1x1x32xf32> to vector<1x32xf32>
    %120 = vector.broadcast %119 : vector<1x32xf32> to vector<12x32xf32>
    %121 = arith.addf %117, %120 : vector<12x32xf32>
    %122 = arith.negf %121 : vector<12x32xf32>
    %123 = math.exp %122 : vector<12x32xf32>
    %cst_73 = arith.constant 1.000000e+00 : f32
    %124 = vector.broadcast %cst_73 : f32 to vector<12x32xf32>
    %125 = arith.addf %124, %123 : vector<12x32xf32>
    %126 = arith.divf %124, %125 : vector<12x32xf32>
    %127 = arith.mulf %121, %126 : vector<12x32xf32>
    %c1_74 = arith.constant 1 : index
    %c0_75 = arith.constant 0 : index
    %c0_76 = arith.constant 0 : index
    %128 = vector.load %arg13[%c1_74, %c0_75, %c0_76] : memref<2x1x32xf32, #tpu.memory_space<vmem>>, vector<1x1x32xf32>
    %129 = vector.shape_cast %128 : vector<1x1x32xf32> to vector<1x32xf32>
    %130 = vector.broadcast %129 : vector<1x32xf32> to vector<12x32xf32>
    %131 = arith.mulf %127, %130 : vector<12x32xf32>
    %c1_77 = arith.constant 1 : index
    %c0_78 = arith.constant 0 : index
    %c0_79 = arith.constant 0 : index
    %132 = vector.load %arg14[%c1_77, %c0_78, %c0_79] : memref<2x1x32xf32, #tpu.memory_space<vmem>>, vector<1x1x32xf32>
    %133 = vector.shape_cast %132 : vector<1x1x32xf32> to vector<1x32xf32>
    %134 = vector.broadcast %133 : vector<1x32xf32> to vector<12x32xf32>
    %135 = arith.addf %131, %134 : vector<12x32xf32>
    %c1_80 = arith.constant 1 : index
    %c0_81 = arith.constant 0 : index
    %c0_82 = arith.constant 0 : index
    %136 = vector.load %arg15[%c1_80, %c0_81, %c0_82] : memref<2x32x32xf32, #tpu.memory_space<vmem>>, vector<1x32x32xf32>
    %137 = vector.shape_cast %136 : vector<1x32x32xf32> to vector<32x32xf32>
    %cst_83 = arith.constant dense<0.000000e+00> : vector<12x32xf32>
    %138 = tpu.matmul %135, %137, %cst_83 {dimension_numbers = #tpu.dot_dimension_numbers<[1], [0], [0], [1], [0, 0, 1, 1], [], []>} : vector<12x32xf32>, vector<32x32xf32>, vector<12x32xf32> -> vector<12x32xf32>
    %c1_84 = arith.constant 1 : index
    %c0_85 = arith.constant 0 : index
    %c0_86 = arith.constant 0 : index
    %139 = vector.load %arg16[%c1_84, %c0_85, %c0_86] : memref<2x1x32xf32, #tpu.memory_space<vmem>>, vector<1x1x32xf32>
    %140 = vector.shape_cast %139 : vector<1x1x32xf32> to vector<1x32xf32>
    %141 = vector.broadcast %140 : vector<1x32xf32> to vector<12x32xf32>
    %142 = arith.addf %138, %141 : vector<12x32xf32>
    %143 = arith.negf %142 : vector<12x32xf32>
    %144 = math.exp %143 : vector<12x32xf32>
    %cst_87 = arith.constant 1.000000e+00 : f32
    %145 = vector.broadcast %cst_87 : f32 to vector<12x32xf32>
    %146 = arith.addf %145, %144 : vector<12x32xf32>
    %147 = arith.divf %145, %146 : vector<12x32xf32>
    %148 = arith.mulf %142, %147 : vector<12x32xf32>
    %cst_88 = arith.constant dense<0.000000e+00> : vector<16x32xf32>
    %149 = tpu.matmul %41, %148, %cst_88 {dimension_numbers = #tpu.dot_dimension_numbers<[1], [0], [0], [1], [0, 0, 1, 1], [], []>} : vector<16x12xf32>, vector<12x32xf32>, vector<16x32xf32> -> vector<16x32xf32>
    %150 = tpu.concatenate %109, %149 in 1 : vector<16x32xf32>, vector<16x32xf32> -> vector<16x64xf32>
    %c1_89 = arith.constant 1 : index
    %c0_90 = arith.constant 0 : index
    %c0_91 = arith.constant 0 : index
    %151 = vector.load %arg17[%c1_89, %c0_90, %c0_91] : memref<2x64x32xf32, #tpu.memory_space<vmem>>, vector<1x64x32xf32>
    %152 = vector.shape_cast %151 : vector<1x64x32xf32> to vector<64x32xf32>
    %cst_92 = arith.constant dense<0.000000e+00> : vector<16x32xf32>
    %153 = tpu.matmul %150, %152, %cst_92 {dimension_numbers = #tpu.dot_dimension_numbers<[1], [0], [0], [1], [0, 0, 1, 1], [], []>} : vector<16x64xf32>, vector<64x32xf32>, vector<16x32xf32> -> vector<16x32xf32>
    %c1_93 = arith.constant 1 : index
    %c0_94 = arith.constant 0 : index
    %c0_95 = arith.constant 0 : index
    %154 = vector.load %arg18[%c1_93, %c0_94, %c0_95] : memref<2x1x32xf32, #tpu.memory_space<vmem>>, vector<1x1x32xf32>
    %155 = vector.shape_cast %154 : vector<1x1x32xf32> to vector<1x32xf32>
    %156 = vector.broadcast %155 : vector<1x32xf32> to vector<16x32xf32>
    %157 = arith.addf %153, %156 : vector<16x32xf32>
    %158 = arith.negf %157 : vector<16x32xf32>
    %159 = math.exp %158 : vector<16x32xf32>
    %cst_96 = arith.constant 1.000000e+00 : f32
    %160 = vector.broadcast %cst_96 : f32 to vector<16x32xf32>
    %161 = arith.addf %160, %159 : vector<16x32xf32>
    %162 = arith.divf %160, %161 : vector<16x32xf32>
    %163 = arith.mulf %157, %162 : vector<16x32xf32>
    %c1_97 = arith.constant 1 : index
    %c0_98 = arith.constant 0 : index
    %c0_99 = arith.constant 0 : index
    %164 = vector.load %arg19[%c1_97, %c0_98, %c0_99] : memref<2x32x32xf32, #tpu.memory_space<vmem>>, vector<1x32x32xf32>
    %165 = vector.shape_cast %164 : vector<1x32x32xf32> to vector<32x32xf32>
    %cst_100 = arith.constant dense<0.000000e+00> : vector<16x32xf32>
    %166 = tpu.matmul %163, %165, %cst_100 {dimension_numbers = #tpu.dot_dimension_numbers<[1], [0], [0], [1], [0, 0, 1, 1], [], []>} : vector<16x32xf32>, vector<32x32xf32>, vector<16x32xf32> -> vector<16x32xf32>
    %c1_101 = arith.constant 1 : index
    %c0_102 = arith.constant 0 : index
    %c0_103 = arith.constant 0 : index
    %167 = vector.load %arg20[%c1_101, %c0_102, %c0_103] : memref<2x1x32xf32, #tpu.memory_space<vmem>>, vector<1x1x32xf32>
    %168 = vector.shape_cast %167 : vector<1x1x32xf32> to vector<1x32xf32>
    %169 = vector.broadcast %168 : vector<1x32xf32> to vector<16x32xf32>
    %170 = arith.addf %166, %169 : vector<16x32xf32>
    %171 = arith.negf %170 : vector<16x32xf32>
    %172 = math.exp %171 : vector<16x32xf32>
    %cst_104 = arith.constant 1.000000e+00 : f32
    %173 = vector.broadcast %cst_104 : f32 to vector<16x32xf32>
    %174 = arith.addf %173, %172 : vector<16x32xf32>
    %175 = arith.divf %173, %174 : vector<16x32xf32>
    %176 = arith.mulf %170, %175 : vector<16x32xf32>
    %177 = arith.addf %109, %176 : vector<16x32xf32>
    %c0_105 = arith.constant 0 : index
    %c0_106 = arith.constant 0 : index
    %178 = vector.load %arg21[%c0_105, %c0_106] : memref<32x192xf32, #tpu.memory_space<vmem>>, vector<32x192xf32>
    %cst_107 = arith.constant dense<0.000000e+00> : vector<16x192xf32>
    %179 = tpu.matmul %177, %178, %cst_107 {dimension_numbers = #tpu.dot_dimension_numbers<[1], [0], [0], [1], [0, 0, 1, 1], [], []>} : vector<16x32xf32>, vector<32x192xf32>, vector<16x192xf32> -> vector<16x192xf32>
    %c0_108 = arith.constant 0 : index
    %c0_109 = arith.constant 0 : index
    %180 = vector.load %arg22[%c0_108, %c0_109] : memref<1x192xf32, #tpu.memory_space<vmem>>, vector<1x192xf32>
    %181 = vector.broadcast %180 : vector<1x192xf32> to vector<16x192xf32>
    %182 = arith.addf %179, %181 : vector<16x192xf32>
    %cst_110 = arith.constant 0.000000e+00 : f32
    %183 = vector.broadcast %cst_110 : f32 to vector<16x192xf32>
    %184 = arith.cmpf ogt, %182, %183 : vector<16x192xf32>
    %cst_111 = arith.constant 0.00999999977 : f32
    %185 = vector.broadcast %cst_111 : f32 to vector<16x192xf32>
    %186 = arith.mulf %185, %182 : vector<16x192xf32>
    %187 = arith.select %184, %182, %186 : vector<16x192xi1>, vector<16x192xf32>
    %188 = arith.addf %182, %187 : vector<16x192xf32>
    %c0_112 = arith.constant 0 : index
    %c0_113 = arith.constant 0 : index
    %189 = vector.load %arg23[%c0_112, %c0_113] : memref<192x192xf32, #tpu.memory_space<vmem>>, vector<192x192xf32>
    %cst_114 = arith.constant dense<0.000000e+00> : vector<16x192xf32>
    %190 = tpu.matmul %188, %189, %cst_114 {dimension_numbers = #tpu.dot_dimension_numbers<[1], [0], [0], [1], [0, 0, 1, 1], [], []>} : vector<16x192xf32>, vector<192x192xf32>, vector<16x192xf32> -> vector<16x192xf32>
    %c0_115 = arith.constant 0 : index
    %c0_116 = arith.constant 0 : index
    %191 = vector.load %arg24[%c0_115, %c0_116] : memref<1x192xf32, #tpu.memory_space<vmem>>, vector<1x192xf32>
    %192 = vector.broadcast %191 : vector<1x192xf32> to vector<16x192xf32>
    %193 = arith.addf %190, %192 : vector<16x192xf32>
    %cst_117 = arith.constant 0.000000e+00 : f32
    %194 = vector.broadcast %cst_117 : f32 to vector<16x192xf32>
    %195 = arith.cmpf ogt, %193, %194 : vector<16x192xf32>
    %cst_118 = arith.constant 0.00999999977 : f32
    %196 = vector.broadcast %cst_118 : f32 to vector<16x192xf32>
    %197 = arith.mulf %196, %193 : vector<16x192xf32>
    %198 = arith.select %195, %193, %197 : vector<16x192xi1>, vector<16x192xf32>
    %199 = arith.addf %193, %198 : vector<16x192xf32>
    %c0_119 = arith.constant 0 : index
    %c0_120 = arith.constant 0 : index
    %200 = vector.load %arg25[%c0_119, %c0_120] : memref<192x128xf32, #tpu.memory_space<vmem>>, vector<192x128xf32>
    %cst_121 = arith.constant dense<0.000000e+00> : vector<16x128xf32>
    %201 = tpu.matmul %199, %200, %cst_121 {dimension_numbers = #tpu.dot_dimension_numbers<[1], [0], [0], [1], [0, 0, 1, 1], [], []>} : vector<16x192xf32>, vector<192x128xf32>, vector<16x128xf32> -> vector<16x128xf32>
    %c0_122 = arith.constant 0 : index
    %c0_123 = arith.constant 0 : index
    %202 = vector.load %arg26[%c0_122, %c0_123] : memref<1x128xf32, #tpu.memory_space<vmem>>, vector<1x128xf32>
    %203 = vector.broadcast %202 : vector<1x128xf32> to vector<16x128xf32>
    %204 = arith.addf %201, %203 : vector<16x128xf32>
    %c0_124 = arith.constant 0 : index
    %c0_125 = arith.constant 0 : index
    %205 = vector.load %arg27[%c0_124, %c0_125] : memref<16x128xf32, #tpu.memory_space<vmem>>, vector<16x128xf32>
    tpu.vector_store %arg27[%c0_124, %c0_125], %204 {strides = array<i32>} : memref<16x128xf32, #tpu.memory_space<vmem>>, vector<16x128xf32>,
    return
  }
}

</mosaic_0001>

<bundles_post_ra>
// kernel: tpu_custom_call.1
= control target key start
LH: loop header
LB: loop body
LE: loop exit
PB: predicated region body
PF: predicated region fallthrough
CT: control target
= control target key end

     0   :  { %s2584_s0 = inlined_call_operand.hbm [shape: f32[16,21], index: 0, kind: input, shape index: {}]   ;;  %s2585_s1 = inlined_call_operand.vmem [shape: f32[16,1], index: 1, kind: input, shape index: {}]   ;;  %s2586_s2 = inlined_call_operand.vmem [shape: s32[12,1], index: 2, kind: input, shape index: {}]   ;;  %s2587_s3 = inlined_call_operand.vmem [shape: s32[12,1], index: 3, kind: input, shape index: {}]   ;;  %s2588_s4 = inlined_call_operand.vmem [shape: s32[1,12], index: 4, kind: input, shape index: {}]   ;;  %s2589_s5 = inlined_call_operand.vmem [shape: f32[16,1], index: 5, kind: input, shape index: {}]   ;;  %s2590_s6 = inlined_call_operand.hbm [shape: f32[21,64], index: 6, kind: input, shape index: {}]   ;;  %s2591_s7 = inlined_call_operand.vmem [shape: f32[1,64], index: 7, kind: input, shape index: {}]   ;;  %s2592_s8 = inlined_call_operand.vmem [shape: f32[64,32], index: 8, kind: input, shape index: {}]   ;;  %s2593_s9 = inlined_call_operand.hbm [shape: f32[1,32], index: 9, kind: input, shape index: {}]   ;;  %s2594_s10 = inlined_call_operand.hbm [shape: f32[1,32], index: 10, kind: input, shape index: {}]   ;;  %s2595_s11 = inlined_call_operand.vmem [shape: f32[2,32,64], index: 11, kind: input, shape index: {}]   ;;  %s2596_s12 = inlined_call_operand.vmem [shape: f32[2,1,32], index: 12, kind: input, shape index: {}]   ;;  %s2597_s13 = inlined_call_operand.vmem [shape: f32[2,1,32], index: 13, kind: input, shape index: {}]   ;;  %s2598_s14 = inlined_call_operand.vmem [shape: f32[2,1,32], index: 14, kind: input, shape index: {}]   ;;  %s2599_s15 = inlined_call_operand.hbm [shape: f32[2,32,32], index: 15, kind: input, shape index: {}]   ;;  %s2600_s16 = inlined_call_operand.vmem [shape: f32[2,1,32], index: 16, kind: input, shape index: {}]   ;;  %s2601_s17 = inlined_call_operand.vmem [shape: f32[2,64,32], index: 17, kind: input, shape index: {}]   ;;  %s2602_s18 = inlined_call_operand.vmem [shape: f32[2,1,32], index: 18, kind: input, shape index: {}]   ;;  %s2603_s19 = inlined_call_operand.hbm [shape: f32[2,32,32], index: 19, kind: input, shape index: {}]   ;;  %s2604_s20 = inlined_call_operand.vmem [shape: f32[2,1,32], index: 20, kind: input, shape index: {}]   ;;  %s2605_s21 = inlined_call_operand.hbm [shape: f32[32,192], index: 21, kind: input, shape index: {}]   ;;  %s2606_s22 = inlined_call_operand.vmem [shape: f32[1,192], index: 22, kind: input, shape index: {}]   ;;  %s2607_s23 = inlined_call_operand.hbm [shape: f32[192,192], index: 23, kind: input, shape index: {}]   ;;  %s2608_s24 = inlined_call_operand.vmem [shape: f32[1,192], index: 24, kind: input, shape index: {}]   ;;  %s2609_s25 = inlined_call_operand.vmem [shape: f32[192,128], index: 25, kind: input, shape index: {}]   ;;  %s2610_s26 = inlined_call_operand.vmem [shape: f32[1,128], index: 26, kind: input, shape index: {}]   ;;  %s2611_s27 = inlined_call_operand.hbm [shape: f32[16,128], index: 27, kind: output, shape index: {}]  }
   0x1   :  { %2618 = sst [smem:[#allocation23_spill]] %s2584_s0 }
   0x2   :  { %2619 = sst [smem:[#allocation24_spill]] %s2585_s1 }
   0x3   :  { %2620 = sst [smem:[#allocation25_spill]] %s2586_s2 }
   0x4   :  { %2621 = sst [smem:[#allocation26_spill]] %s2587_s3 }
   0x5   :  { %2622 = sst [smem:[#allocation27_spill]] %s2588_s4 }
   0x6   :  { %2623 = sst [smem:[#allocation28_spill]] %s2589_s5 }
   0x7   :  { %2624 = sst [smem:[#allocation29_spill]] %s2590_s6 }
   0x8   :  { %2625 = sst [smem:[#allocation30_spill]] %s2591_s7 }
   0x9   :  { %2626 = sst [smem:[#allocation31_spill]] %s2592_s8 }
   0xa   :  { %2627 = sst [smem:[#allocation32_spill]] %s2593_s9 }
   0xb   :  { %2628 = sst [smem:[#allocation33_spill]] %s2594_s10 }
   0xc   :  { %2629 = sst [smem:[#allocation34_spill]] %s2595_s11 }
   0xd   :  { %2630 = sst [smem:[#allocation35_spill]] %s2611_s27 }
   0xe   :  { %32 = vsyncpa [#allocation3], 0 }
   0xf   :  { %33 = vsyncpa [#allocation6], 0 }
  0x10   :  { %34 = vsyncpa [#allocation9], 0 }
  0x11   :  { %35 = vsyncpa [#allocation12], 0 }
  0x12   :  { %36 = vsyncpa [#allocation15], 0 }
  0x13   :  { %37 = vsyncpa [#allocation4], 0  ;;  %s2631_s8 = sld [smem:[#allocation29_spill]]  ;;  %s2023_s9 = smov [#allocation5]  }
  0x14   :  { %s67_s5 = sshll.u32 %s2023_s9, 4  ;;  %s2632_s10 = sld [smem:[#allocation33_spill]]  ;;  %s68_s5 = int_to_ptr.vmem [resolvable:$true] %s67_s5 }
  0x15   :  { %s2024_s1 = smov 128   ;;  %s2025_s6 = smov 8  }
  0x16   :  { %s2026_s11 = smov [#allocation8]   ;;  %s131_s4 = sshll.u32 %s2603_s19, 4  ;;  %s132_s4 = int_to_ptr.hbm [resolvable:$true] %s131_s4 }
  0x17   :  { %s96_s2 = sshll.u32 %s2026_s11, 4  ;;  %s2633_s28 = sld [smem:[#allocation23_spill]]  ;;  %s97_s2 = int_to_ptr.vmem [resolvable:$true] %s96_s2 }
  0x18   :  { %s2634_s19 = sld [smem:[#allocation32_spill]]  ;;  %s2029_s9 = smov [#allocation7]  }
  0x19   :  { %s65_s30 = sshll.u32 %s2631_s8, 4  ;;  %s112_s8 = sshll.u32 %s2599_s15, 4  ;;  %s66_s30 = int_to_ptr.hbm [resolvable:$true] %s65_s30  ;;  %s113_s8 = int_to_ptr.hbm [resolvable:$true] %s112_s8 }
  0x1a   :  { %s94_s29 = sshll.u32 %s2632_s10, 4  ;;  %s2027_s10 = smov [#allocation11]   ;;  %s95_s29 = int_to_ptr.hbm [resolvable:$true] %s94_s29 }
  0x1b   :  { %73 = dma.hbm_to_vmem [thread:$0]  %s66_s30, 384, %s68_s5, [#allocation6], %s2024_s1, %s2024_s1, %s2025_s6  }
  0x1c   :  { %99 = dma.hbm_to_vmem [thread:$0]  %s95_s29, 16, %s97_s2, [#allocation9]  }
  0x1d   :  { %s42_s0 = sshll.u32 %s2633_s28, 4  ;;  %s133_s27 = sshll.u32 %s2027_s10, 4  ;;  %s43_s0 = int_to_ptr.hbm [resolvable:$true] %s42_s0  ;;  %s134_s27 = int_to_ptr.vmem [resolvable:$true] %s133_s27 }
  0x1e   :  { %139 = dma.hbm_to_vmem [thread:$0]  %s132_s4, 1024, %s134_s27, [#allocation12], %s2024_s1, %s2024_s1, %s2025_s6  }
  0x1f   :  { %s2028_s30 = smov [#allocation2]   ;;  %s83_s7 = sshll.u32 %s2634_s19, 4  ;;  %s84_s7 = int_to_ptr.hbm [resolvable:$true] %s83_s7 }
  0x20   :  { %s44_s5 = sshll.u32 %s2028_s30, 4  ;;  %s85_s28 = sshll.u32 %s2029_s9, 4  ;;  %s45_s5 = int_to_ptr.vmem [resolvable:$true] %s44_s5  ;;  %s86_s28 = int_to_ptr.vmem [resolvable:$true] %s85_s28 }
  0x21   :  { %50 = dma.hbm_to_vmem [thread:$0]  %s43_s0, 256, %s45_s5, [#allocation3], %s2024_s1, %s2024_s1, %s2025_s6  }
  0x22   :  { %88 = dma.hbm_to_vmem [thread:$0]  %s84_s7, 16, %s86_s28, [#allocation6]  }
  0x23   :  { %s2030_s27 = smov [#allocation10]   ;;  %s146_s11 = sshll.u32 %s2605_s21, 4  ;;  %s147_s11 = int_to_ptr.hbm [resolvable:$true] %s146_s11 }
  0x24   :  { %s114_s4 = sshll.u32 %s2030_s27, 4  ;;  %s2031_s0 = smov [#allocation13]   ;;  %s115_s4 = int_to_ptr.vmem [resolvable:$true] %s114_s4 }
  0x25   :  { %120 = dma.hbm_to_vmem [thread:$0]  %s113_s8, 1024, %s115_s4, [#allocation9], %s2024_s1, %s2024_s1, %s2025_s6  }
  0x26   :  { %s148_s5 = sshll.u32 %s2031_s0, 4  ;;  %s161_s19 = sshll.u32 %s2607_s23, 4  ;;  %s149_s5 = int_to_ptr.vmem [resolvable:$true] %s148_s5  ;;  %s162_s19 = int_to_ptr.hbm [resolvable:$true] %s161_s19 }
  0x27   :  { %s2032_s7 = smov 256   ;;  %s2033_s29 = smov 16  }
  0x28   :  { %154 = dma.hbm_to_vmem [thread:$0]  %s147_s11, 1024, %s149_s5, [#allocation12], %s2032_s7, %s2032_s7, %s2033_s29  }
  0x29   :  { %s2034_s2 = smov [#allocation14]  }
  0x2a   :  { %s163_s9 = sshll.u32 %s2034_s2, 4  ;;  %s164_s9 = int_to_ptr.vmem [resolvable:$true] %s163_s9 }
  0x2b   :  { %169 = dma.hbm_to_vmem [thread:$0]  %s162_s19, 6144, %s164_s9, [#allocation15], %s2032_s7, %s2032_s7, %s2033_s29  }
  0x2c   :  { %2011 = dma.done.wait [#allocation3], 256  }
  0x2d   :  { %2012 = vsyncadd [#allocation3], 4294967040 }
  0x2e   :  { %2013 = dma.done.wait [#allocation6], 400  }
  0x2f   :  { %2014 = vsyncadd [#allocation6], 4294966896 }
  0x30   :  { %2015 = dma.done.wait [#allocation9], 1040  }
  0x31   :  { %2016 = vsyncadd [#allocation9], 4294966256 }
  0x32   :  { %2017 = dma.done.wait [#allocation12], 2048  }
  0x33   :  { %2018 = vsyncadd [#allocation12], 4294965248 }
  0x34   :  { %2019 = dma.done.wait [#allocation15], 6144  }
  0x35   :  { %2020 = vsyncadd [#allocation15], 4294961152  ;;  %v2035_v0 = vmov 0   ;;  %vm224_vm0 = vcmask 1044480   ;;  %v212_v1 = vld [vmem:[#allocation5 + $0x10] sm:$0x1f]  ;;  %v321_v52 = vlaneseq }
  0x36   :  { %1701 = vset.pattern.permute.xlu0 %v2035_v0  ;;  %1707 = vset.pattern.permute.xlu1 %v2035_v0  ;;  %v211_v2 = vld [vmem:[#allocation5 + $0x8] sm:$0xff]  ;;  %s2635_s8 = sld [smem:[#allocation31_spill]]  ;;  %v210_v4 = vld [vmem:[#allocation5] sm:$0xff]  ;;  %v208_v5 = vld [vmem:[#allocation2] sm:$0xff]  ;;  %vm217_vm1 = vcmask 171008   ;;  %vm283_vm3 = vcmask 523264  }
  0x37   :  { %1708 = vset.pattern.permute.xlu2 %v2035_v0  ;;  %1599 = vmatpush.msk.msra.mxu0 %vm224_vm0, %v212_v1  ;;  %s2636_s0 = sld [smem:[#allocation24_spill]]  ;;  %v209_v11 = vld [vmem:[#allocation2 + $0x8] sm:$0xff]  ;;  %vm380_vm5 = vcmask 261120   ;;  %v322_v54 = vand.u32 127, %v321_v52  ;;  %vm418_vm6 = vcmask 130048   ;;  %v2037_v56 = vmov 0.0  }
  0x38   :  { %s2637_s30 = sld [smem:[#allocation26_spill]]  ;;  %v1715_v30 = vld [vmem:[#allocation7] ss:$0 sm:$0xff]  ;;  %v1716_v33 = vld [vmem:[#allocation8] ss:$0 sm:$0xff]  ;;  %s2038_s11 = smov 32  }
  0x39   :  { %242 = vmatpush.msra.mxu0 %v211_v2  ;;  %s2638_s15 = sld [smem:[#allocation30_spill]]  ;;  %v1718_v2 = vld [vmem:[%s2596_s12] ss:$0 sm:$0xff] }
  0x3a   :  { %s2639_s3 = sld [smem:[#allocation34_spill]] }
  0x3b   :  { %243 = vmatpush.msra.mxu0 %v210_v4  ;;  %s2640_s27 = sld [smem:[#allocation25_spill]] }
  0x3c   :  { %v282_v3 = vld [vmem:[%s2635_s8 + $0x38] sm:$0xff]  ;;  %v281_v6 = vld [vmem:[%s2635_s8 + $0x30] sm:$0xff]  ;;  %v280_v7 = vld [vmem:[%s2635_s8 + $0x28] sm:$0xff]  ;;  %1600 = vmatmul.msk.f32.vlgmr.msra.gmra.mxu0 %vm217_vm1, %v208_v5  ;;  %s2642_s5 = sld [smem:[#allocation27_spill]] }
  0x3d   :  { %298 = vmatpush.msra.mxu1 %v282_v3  ;;  %v257_v8 = vld [vmem:[%s2636_s0] sm:$0xff]  ;;  %v278_v10 = vld [vmem:[%s2635_s8 + $0x18] sm:$0xff]  ;;  %v277_v12 = vld [vmem:[%s2635_s8 + $0x10] sm:$0xff] }
  0x3e   :  { %v279_v9 = vld [vmem:[%s2635_s8 + $0x20] sm:$0xff]  ;;  %262 = vperm.xlu0 %1701, %v257_v8   ;;  %v276_v13 = vld [vmem:[%s2635_s8 + $0x8] sm:$0xff]  ;;  %v536_v8 = vld [vmem:[#allocation10 + $0x8] sm:$0xff] }
  0x3f   :  { %299 = vmatpush.msra.mxu1 %v281_v6  ;;  %v275_v14 = vld [vmem:[%s2635_s8] sm:$0xff]  ;;  %v258_v15 = vld [vmem:[%s2636_s0 + $0x8] sm:$0xff]  ;;  %s2036_s8 = smov 96  }
  0x40   :  { %v324_v16 = vld [vmem:[%s2637_s30 + $0x8] sm:$0xf]  ;;  %v1714_v17 = vld [vmem:[%s2638_s15] ss:$0 sm:$0xff]  ;;  %v379_v26 = vld [vmem:[%s2639_s3 + $0x18] sm:$0xff]  ;;  %s2641_s15 = sld [smem:[#allocation28_spill]] }
  0x41   :  { %300 = vmatpush.msra.mxu1 %v280_v7  ;;  %399 = vmatpush.msra.mxu2 %v379_v26  ;;  %v378_v27 = vld [vmem:[%s2639_s3 + $0x10] sm:$0xff]  ;;  %v377_v28 = vld [vmem:[%s2639_s3 + $0x8] sm:$0xff]  ;;  %v376_v29 = vld [vmem:[%s2639_s3] sm:$0xff] }
  0x42   :  { %v338_v42 = vld [vmem:[%s2640_s27 + $0x8] sm:$0xf]  ;;  %v323_v44 = vld [vmem:[%s2637_s30] sm:$0xff] }
  0x43   :  { %301 = vmatpush.msra.mxu1 %v279_v9  ;;  %400 = vmatpush.msra.mxu2 %v378_v27  ;;  %v337_v48 = vld [vmem:[%s2640_s27] sm:$0xff] }
  0x44   :  { %1601 = vmatmul.msk.f32.gmra.mxu0 %vm217_vm1, %v209_v11  ;;  %343 = vperm.xlu2 %1708, %v338_v42   ;;  %v538_v3 = vld [vmem:[#allocation10 + $0x18] sm:$0xff]  ;;  %v537_v6 = vld [vmem:[#allocation10 + $0x10] sm:$0xff] }
  0x45   :  { %302 = vmatpush.msra.mxu1 %v278_v10  ;;  %401 = vmatpush.msra.mxu2 %v377_v28  ;;  %v535_v10 = vld [vmem:[#allocation10] sm:$0xff] }
  0x46   :  { %267 = vperm.xlu0 %1701, %v258_v15   ;;  %v363_v47 = vld [vmem:[%s2641_s15 + $0x8] sm:$0xff]  ;;  %v362_v49 = vld [vmem:[%s2641_s15] sm:$0xff]  ;;  %561 = vmatpush.msrb.mxu0 %v538_v3 }
  0x47   :  { %303 = vmatpush.msra.mxu1 %v277_v12  ;;  %402 = vmatpush.msra.mxu2 %v376_v29  ;;  %v1719_v29 = vld [vmem:[%s2597_s13] ss:$0 sm:$0xff] }
  0x48   :  { %562 = vmatpush.msrb.mxu0 %v537_v6 }
  0x49   :  { %304 = vmatpush.msra.mxu1 %v276_v13 }
  0x4a   :  { %563 = vmatpush.msrb.mxu0 %v536_v8 }
  0x4b   :  { %305 = vmatpush.msra.mxu1 %v275_v14 }
  0x4c   :  { %326 = vperm.xlu2 %1708, %v323_v44   ;;  %564 = vmatpush.msrb.mxu0 %v535_v10  ;;  %v1717_v10 = vld [vmem:[%s2642_s5] ss:$0 sm:$0xff] }
  0x4e   :  { %329 = vperm.xlu0 %1701, %v324_v16  }
  0x54   :  { %371 = vperm.xlu2 %1708, %v363_v47  }
  0x9e   :  { %v344_v58 = vpop.permute.xlu2 %343 }
  0x9f   :  { %vm346_vm8 = vcmp.eq.s32.totalorder %v322_v54, %v344_v58 }
  0xa0   :  { %v2297_v59 = vsel %vm346_vm8, 1.0, %v2037_v56 }
  0xa6   :  { %v327_v60 = vpop.permute.xlu2 %326 }
  0xa7   :  { %vm331_vm9 = vcmp.eq.s32.totalorder %v322_v54, %v327_v60 }
  0xa8   :  { %v2302_v61 = vsel %vm331_vm9, 1.0, %v2037_v56 }
  0xb0   :  { %v263_v31 = vpop.permute.xlu0 %262 }
  0xb1   :  { %v273_v32 = vmul.f32 %v1715_v30, %v263_v31 }
  0xb8   :  { %v268_v37 = vpop.permute.xlu0 %267 }
  0xb9   :  { %v245_v18 = vpop.f32.mrf.mxu0  ;;  %v274_v38 = vmul.f32 %v1715_v30, %v268_v37 }
  0xba   :  { %v246_v19 = vadd.f32 %v1714_v17, %v245_v18 }
  0xbc   :  { %v253_v20 = vmul.f32 0.01, %v246_v19  ;;  %vm251_vm2 = vcmp.gt.f32.partialorder %v246_v19, 0.0 }
  0xbe   :  { %v255_v21 = vsel %vm251_vm2, %v246_v19, %v253_v20 }
  0xbf   :  { %1602 = vmatmul.msk.f32.vlgmr.msra.gmra.mxu1 %vm283_vm3, %v255_v21 }
  0xc0   :  { %v330_v62 = vpop.permute.xlu0 %329 }
  0xc1   :  { %v248_v22 = vpop.f32.mrf.mxu0  ;;  %vm332_vm10 = vcmp.eq.s32.totalorder %v322_v54, %v330_v62 }
  0xc2   :  { %v249_v23 = vadd.f32 %v1714_v17, %v248_v22  ;;  %v2307_v63 = vsel %vm332_vm10, 1.0, %v2037_v56 }
  0xc4   :  { %v254_v24 = vmul.f32 0.01, %v249_v23  ;;  %vm252_vm4 = vcmp.gt.f32.partialorder %v249_v23, 0.0 }
  0xc6   :  { %v256_v25 = vsel %vm252_vm4, %v249_v23, %v254_v24 }
  0xc7   :  { %1603 = vmatmul.msk.f32.gmra.mxu1 %vm283_vm3, %v256_v25 }
 0x13c   :  { %v307_v34 = vpop.f32.mrf.mxu1 }
 0x13d   :  { %v313_v35 = vadd.f32 %v307_v34, %v273_v32  ;;  %v1720_v34 = vld [vmem:[%s2598_s14] ss:$0 sm:$0xff] }
 0x13f   :  { %v2266_v36 = vadd.f32 %v1716_v33, %v313_v35 }
 0x141   :  { %1610 = vmatmul.msk.f32.vlgmr.msra.gmra.mxu2 %vm380_vm5, %v2266_v36 }
 0x144   :  { %v310_v39 = vpop.f32.mrf.mxu1 }
 0x145   :  { %v314_v40 = vadd.f32 %v310_v39, %v274_v38 }
 0x147   :  { %v2270_v41 = vadd.f32 %v1716_v33, %v314_v40 }
 0x149   :  { %1611 = vmatmul.msk.f32.gmra.mxu2 %vm380_vm5, %v2270_v41 }
 0x1c4   :  { %v404_v43 = vpop.f32.mrf.mxu2 }
 0x1cc   :  { %v407_v45 = vpop.f32.mrf.mxu2 }
 0x1cd   :  { %v1702_v46 = vpack.i.bf16 %v404_v43, %v407_v45 }
 0x1cf   :  { %1703 = vrot.lane.b32.xlu1 %v1702_v46, %s2036_s8 }
 0x1d7   :  { %340 = vperm.xlu1 %1707, %v337_v48  }
 0x1df   :  { %366 = vperm.xlu1 %1707, %v362_v49   ;;  %v1721_v49 = vld [vmem:[%s2600_s16] ss:$0 sm:$0xff] }
 0x241   :  { %v1704_v50 = vpop.permute.xlu1 %1703 }
 0x242   :  { %v1705_v51 = vunpack.i.l.bf16 %v1704_v50  ;;  %v1706_v53 = vunpack.i.h.bf16 %v1704_v50 }
 0x244   :  { %439 = vmatpush.msra.mxu3 %v1705_v51 }
 0x246   :  { %440 = vmatpush.msra.mxu3 %v1706_v53 }
 0x248   :  { %468 = vmatpush.msrb.mxu3 %v407_v45 }
 0x249   :  { %v341_v55 = vpop.permute.xlu1 %340 }
 0x24a   :  { %469 = vmatpush.msrb.mxu3 %v404_v43  ;;  %vm345_vm7 = vcmp.eq.s32.totalorder %v322_v54, %v341_v55 }
 0x24b   :  { %v2292_v57 = vsel %vm345_vm7, 1.0, %v2037_v56 }
 0x24c   :  { %1612 = vmatmul.msk.f32.vlgmr.msra.gmra.mxu3 %vm418_vm6, %v2292_v57 }
 0x254   :  { %1613 = vmatmul.msk.f32.gmra.mxu3 %vm418_vm6, %v2297_v59 }
 0x25c   :  { %1614 = vmatmul.msk.f32.vlgmr.msrb.gmra.mxu3 %vm418_vm6, %v2302_v61 }
 0x264   :  { %1615 = vmatmul.msk.f32.gmra.mxu3 %vm418_vm6, %v2307_v63 }
 0x2cf   :  { %v442_v0 = vpop.f32.mrf.mxu3 }
 0x2d7   :  { %v445_v1 = vpop.f32.mrf.mxu3 }
 0x2df   :  { %v471_v4 = vpop.f32.mrf.mxu3 }
 0x2e0   :  { %v472_v5 = vadd.f32 %v471_v4, %v442_v0 }
 0x2e2   :  { %v481_v7 = vadd.f32 %v1718_v2, %v472_v5 }
 0x2e4   :  { %v1616_v9 = vmul.f32 -1.442695, %v481_v7 }
 0x2e6   :  { %1731 = vpow2.f32 %v1616_v9 }
 0x2e7   :  { %v474_v11 = vpop.f32.mrf.mxu3 }
 0x2e8   :  { %v475_v12 = vadd.f32 %v474_v11, %v445_v1 }
 0x2ea   :  { %v482_v13 = vadd.f32 %v1718_v2, %v475_v12 }
 0x2ec   :  { %v1732_v14 = vpop.eup %1731  ;;  %v1617_v15 = vmul.f32 -1.442695, %v482_v13 }
 0x2ed   :  { %v489_v16 = vadd.f32 1.0, %v1732_v14 }
 0x2ee   :  { %1733 = vpow2.f32 %v1617_v15 }
 0x2ef   :  { %1735 = vrcp.f32 %v489_v16  ;;  %v502_v22 = vand.u32 2147483648, %v489_v16  ;;  %v500_v24 = vand.u32 2147483647, %v489_v16  ;;  %vm496_vm12 = vweird.f32 %v489_v16 }
 0x2f1   :  { %v503_v27 = vor.u32 1.1754944e-38, %v502_v22  ;;  %vm501_vm14 = vcmp.eq.f32.partialorder %v500_v24, 8.507059e+37 }
 0x2f4   :  { %v1734_v17 = vpop.eup %1733 }
 0x2f5   :  { %v1736_v18 = vpop.eup %1735  ;;  %v490_v19 = vadd.f32 1.0, %v1734_v17 }
 0x2f6   :  { %v492_v20 = vmul.f32 %v1736_v18, %v489_v16  ;;  %vm497_vm11 = vweird.f32 %v1736_v18  ;;  %v352_v16 = vshrl.u32 %v321_v52, 7 }
 0x2f7   :  { %1737 = vrcp.f32 %v490_v19  ;;  %vm498_vm13 = vmor %vm496_vm12, %vm497_vm11  ;;  %v517_v35 = vand.u32 2147483648, %v490_v19  ;;  %v515_v39 = vand.u32 2147483647, %v490_v19  ;;  %vm511_vm0 = vweird.f32 %v490_v19 }
 0x2f8   :  { %v493_v21 = vsub.f32 1.0, %v492_v20  ;;  %vm356_vm11 = vcmp.eq.s32.totalorder %v352_v16, %v1717_v10 }
 0x2f9   :  { %v518_v43 = vor.u32 1.1754944e-38, %v517_v35  ;;  %vm516_vm2 = vcmp.eq.f32.partialorder %v515_v39, 8.507059e+37  ;;  %v1608_v24 = vsel %vm356_vm11, 1.0, %v2037_v56  ;;  %v659_v35 = vld [vmem:[%s2601_s17 + $0x18] sm:$0xff] }
 0x2fa   :  { %v494_v23 = vmul.f32 %v1736_v18, %v493_v21 }
 0x2fc   :  { %v495_v25 = vadd.f32 %v1736_v18, %v494_v23 }
 0x2fd   :  { %v1738_v26 = vpop.eup %1737 }
 0x2fe   :  { %v499_v28 = vsel %vm498_vm13, %v1736_v18, %v495_v25  ;;  %v507_v30 = vmul.f32 %v1738_v26, %v490_v19  ;;  %vm512_vm15 = vweird.f32 %v1738_v26  ;;  %v367_v25 = vpop.permute.xlu1 %366 }
 0x2ff   :  { %v504_v31 = vsel %vm501_vm14, %v503_v27, %v499_v28  ;;  %vm513_vm1 = vmor %vm511_vm0, %vm512_vm15  ;;  %vm619_vm15 = vcmask 1043456   ;;  %v353_v27 = vadd.s32 8, %v352_v16  ;;  %vm612_vm0 = vcmask 97280  }
 0x300   :  { %v521_v32 = vmul.f32 %v504_v31, %v481_v7  ;;  %v508_v33 = vsub.f32 1.0, %v507_v30  ;;  %v2331_v28 = vmul.f32 %v1608_v24, %v367_v25  ;;  %v372_v30 = vpop.permute.xlu2 %371 }
 0x302   :  { %v527_v37 = vmul.f32 %v1719_v29, %v521_v32  ;;  %v509_v38 = vmul.f32 %v1738_v26, %v508_v33  ;;  %v663_v32 = vld [vmem:[%s2601_s17 + $0x38] sm:$0xff]  ;;  %v662_v33 = vld [vmem:[%s2601_s17 + $0x30] sm:$0xff] }
 0x304   :  { %v510_v40 = vadd.f32 %v1738_v26, %v509_v38  ;;  %v533_v42 = vadd.f32 %v1720_v34, %v527_v37  ;;  %v658_v37 = vld [vmem:[%s2601_s17 + $0x10] sm:$0xff]  ;;  %v657_v38 = vld [vmem:[%s2601_s17 + $0x8] sm:$0xff] }
 0x306   :  { %v514_v44 = vsel %vm513_vm1, %v1738_v26, %v510_v40  ;;  %1618 = vmatmul.msk.f32.vlgmr.msrb.gmra.mxu0 %vm380_vm5, %v533_v42  ;;  %vm357_vm1 = vcmp.eq.s32.totalorder %v353_v27, %v1717_v10  ;;  %v656_v42 = vld [vmem:[%s2601_s17] sm:$0xff] }
 0x307   :  { %v519_v45 = vsel %vm516_vm2, %v518_v43, %v514_v44  ;;  %v1723_v27 = vld [vmem:[%s2604_s20] ss:$0 sm:$0xff] }
 0x308   :  { %v522_v46 = vmul.f32 %v519_v45, %v482_v13 }
 0x30a   :  { %v528_v47 = vmul.f32 %v1719_v29, %v522_v46  ;;  %v1609_v29 = vsel %vm357_vm1, 1.0, %v2037_v56  ;;  %v660_v56 = vld [vmem:[%s2601_s17 + $0x20] sm:$0xff] }
 0x30b   :  { %v2336_v31 = vmul.f32 %v1609_v29, %v372_v30  ;;  %v1634_v29 = vld [vmem:[%s2639_s3 + $0x28] sm:$0xff] }
 0x30c   :  { %v534_v48 = vadd.f32 %v1720_v34, %v528_v47  ;;  %v661_v34 = vld [vmem:[%s2601_s17 + $0x28] sm:$0xff] }
 0x30d   :  { %v740_v47 = vld [vmem:[#allocation11 + $0x18] sm:$0xff] }
 0x30e   :  { %1619 = vmatmul.msk.f32.gmra.mxu0 %vm380_vm5, %v534_v48  ;;  %763 = vmatpush.msra.mxu3 %v740_v47  ;;  %v739_v48 = vld [vmem:[#allocation11 + $0x10] sm:$0xff] }
 0x310   :  { %764 = vmatpush.msra.mxu3 %v739_v48 }
 0x383   :  { %v566_v50 = vpop.f32.mrf.mxu0 }
 0x384   :  { %v567_v51 = vadd.f32 %v1721_v49, %v566_v50  ;;  %v738_v50 = vld [vmem:[#allocation11 + $0x8] sm:$0xff] }
 0x385   :  { %765 = vmatpush.msra.mxu3 %v738_v50 }
 0x386   :  { %v1620_v53 = vmul.f32 -1.442695, %v567_v51 }
 0x388   :  { %1739 = vpow2.f32 %v1620_v53 }
 0x38b   :  { %v569_v54 = vpop.f32.mrf.mxu0 }
 0x38c   :  { %v570_v55 = vadd.f32 %v1721_v49, %v569_v54  ;;  %v1722_v49 = vld [vmem:[%s2602_s18] ss:$0 sm:$0xff] }
 0x38e   :  { %v1740_v58 = vpop.eup %1739  ;;  %v1621_v60 = vmul.f32 -1.442695, %v570_v55 }
 0x38f   :  { %v578_v62 = vadd.f32 1.0, %v1740_v58 }
 0x390   :  { %1741 = vpow2.f32 %v1621_v60 }
 0x391   :  { %1743 = vrcp.f32 %v578_v62  ;;  %vm585_vm7 = vweird.f32 %v578_v62  ;;  %v591_v12 = vand.u32 2147483648, %v578_v62  ;;  %v589_v15 = vand.u32 2147483647, %v578_v62 }
 0x393   :  { %v592_v20 = vor.u32 1.1754944e-38, %v591_v12  ;;  %vm590_vm14 = vcmp.eq.f32.partialorder %v589_v15, 8.507059e+37 }
 0x396   :  { %v1742_v0 = vpop.eup %1741 }
 0x397   :  { %v1744_v1 = vpop.eup %1743  ;;  %v579_v2 = vadd.f32 1.0, %v1742_v0 }
 0x398   :  { %v581_v3 = vmul.f32 %v1744_v1, %v578_v62  ;;  %vm586_vm4 = vweird.f32 %v1744_v1 }
 0x399   :  { %1745 = vrcp.f32 %v579_v2  ;;  %v606_v11 = vand.u32 2147483648, %v579_v2  ;;  %v604_v14 = vand.u32 2147483647, %v579_v2  ;;  %vm587_vm9 = vmor %vm585_vm7, %vm586_vm4  ;;  %vm600_vm10 = vweird.f32 %v579_v2 }
 0x39a   :  { %v582_v4 = vsub.f32 1.0, %v581_v3 }
 0x39b   :  { %v607_v19 = vor.u32 1.1754944e-38, %v606_v11  ;;  %vm605_vm13 = vcmp.eq.f32.partialorder %v604_v14, 8.507059e+37 }
 0x39c   :  { %v583_v5 = vmul.f32 %v1744_v1, %v582_v4 }
 0x39e   :  { %v584_v9 = vadd.f32 %v1744_v1, %v583_v5 }
 0x39f   :  { %v1746_v6 = vpop.eup %1745 }
 0x3a0   :  { %v596_v7 = vmul.f32 %v1746_v6, %v579_v2  ;;  %vm601_vm8 = vweird.f32 %v1746_v6  ;;  %v588_v18 = vsel %vm587_vm9, %v1744_v1, %v584_v9 }
 0x3a1   :  { %vm602_vm12 = vmor %vm600_vm10, %vm601_vm8  ;;  %v593_v23 = vsel %vm590_vm14, %v592_v20, %v588_v18 }
 0x3a2   :  { %v597_v8 = vsub.f32 1.0, %v596_v7  ;;  %v610_v52 = vmul.f32 %v593_v23, %v567_v51  ;;  %v737_v51 = vld [vmem:[#allocation11] sm:$0xff] }
 0x3a3   :  { %766 = vmatpush.msra.mxu3 %v737_v51 }
 0x3a4   :  { %v598_v13 = vmul.f32 %v1746_v6, %v597_v8 }
 0x3a6   :  { %v599_v17 = vadd.f32 %v1746_v6, %v598_v13 }
 0x3a8   :  { %v603_v21 = vsel %vm602_vm12, %v1746_v6, %v599_v17 }
 0x3a9   :  { %v608_v22 = vsel %vm605_vm13, %v607_v19, %v603_v21 }
 0x3aa   :  { %v611_v26 = vmul.f32 %v608_v22, %v570_v55 }
 0x3ac   :  { %1622 = vmatpush.msk.msrb.mxu2 %vm619_vm15, %v611_v26  ;;  %v1636_v26 = vld [vmem:[%s2639_s3 + $0x38] sm:$0xff] }
 0x3ad   :  { %839 = vmatpush.msra.mxu0 %v1636_v26 }
 0x3ae   :  { %638 = vmatpush.msrb.mxu2 %v610_v52  ;;  %v1635_v52 = vld [vmem:[%s2639_s3 + $0x30] sm:$0xff] }
 0x3af   :  { %1623 = vmatmul.msk.f32.vlgmr.msrb.gmra.mxu2 %vm612_vm0, %v2331_v28  ;;  %840 = vmatpush.msra.mxu0 %v1635_v52 }
 0x3b0   :  { %682 = vmatpush.msra.mxu2 %v663_v32 }
 0x3b1   :  { %841 = vmatpush.msra.mxu0 %v1634_v29 }
 0x3b2   :  { %683 = vmatpush.msra.mxu2 %v662_v33  ;;  %v1633_v33 = vld [vmem:[%s2639_s3 + $0x20] sm:$0xff] }
 0x3b3   :  { %842 = vmatpush.msra.mxu0 %v1633_v33 }
 0x3b4   :  { %684 = vmatpush.msra.mxu2 %v661_v34 }
 0x3b6   :  { %685 = vmatpush.msra.mxu2 %v660_v56 }
 0x3b7   :  { %1624 = vmatmul.msk.f32.gmra.mxu2 %vm612_vm0, %v2336_v31 }
 0x3b8   :  { %686 = vmatpush.msra.mxu2 %v659_v35 }
 0x3ba   :  { %687 = vmatpush.msra.mxu2 %v658_v37 }
 0x3bc   :  { %688 = vmatpush.msra.mxu2 %v657_v38 }
 0x3be   :  { %689 = vmatpush.msra.mxu2 %v656_v42 }
 0x432   :  { %v640_v39 = vpop.f32.mrf.mxu2 }
 0x433   :  { %648 = vrot.lane.b32.xlu0 %v640_v39, %s2038_s11 }
 0x43a   :  { %v643_v40 = vpop.f32.mrf.mxu2 }
 0x43b   :  { %650 = vrot.lane.b32.xlu1 %v643_v40, %s2038_s11 }
 0x4a5   :  { %v649_v43 = vpop.permute.xlu0 %648 }
 0x4a6   :  { %v654_v44 = vsel %vm380_vm5, %v2266_v36, %v649_v43 }
 0x4a7   :  { %1625 = vmatmul.msk.f32.vlgmr.msra.gmra.mxu2 %vm283_vm3, %v654_v44 }
 0x4ad   :  { %v651_v45 = vpop.permute.xlu1 %650 }
 0x4ae   :  { %v655_v46 = vsel %vm380_vm5, %v2270_v41, %v651_v45 }
 0x4af   :  { %1626 = vmatmul.msk.f32.gmra.mxu2 %vm283_vm3, %v655_v46 }
 0x52a   :  { %v691_v53 = vpop.f32.mrf.mxu2 }
 0x52b   :  { %v692_v54 = vadd.f32 %v1722_v49, %v691_v53 }
 0x52d   :  { %v1627_v55 = vmul.f32 -1.442695, %v692_v54 }
 0x52f   :  { %1747 = vpow2.f32 %v1627_v55 }
 0x532   :  { %v694_v58 = vpop.f32.mrf.mxu2 }
 0x533   :  { %v695_v60 = vadd.f32 %v1722_v49, %v694_v58 }
 0x535   :  { %v1748_v62 = vpop.eup %1747  ;;  %v1628_v0 = vmul.f32 -1.442695, %v695_v60 }
 0x536   :  { %v703_v1 = vadd.f32 1.0, %v1748_v62 }
 0x537   :  { %1749 = vpow2.f32 %v1628_v0 }
 0x538   :  { %1751 = vrcp.f32 %v703_v1  ;;  %v716_v7 = vand.u32 2147483648, %v703_v1  ;;  %v714_v9 = vand.u32 2147483647, %v703_v1  ;;  %vm710_vm4 = vweird.f32 %v703_v1 }
 0x53a   :  { %v717_v12 = vor.u32 1.1754944e-38, %v716_v7  ;;  %vm715_vm8 = vcmp.eq.f32.partialorder %v714_v9, 8.507059e+37 }
 0x53d   :  { %v1750_v2 = vpop.eup %1749 }
 0x53e   :  { %v1752_v3 = vpop.eup %1751  ;;  %v704_v4 = vadd.f32 1.0, %v1750_v2 }
 0x53f   :  { %v706_v5 = vmul.f32 %v1752_v3, %v703_v1  ;;  %vm711_vm2 = vweird.f32 %v1752_v3 }
 0x540   :  { %1753 = vrcp.f32 %v704_v4  ;;  %vm712_vm7 = vmor %vm710_vm4, %vm711_vm2  ;;  %v731_v18 = vand.u32 2147483648, %v704_v4  ;;  %v729_v20 = vand.u32 2147483647, %v704_v4  ;;  %vm725_vm10 = vweird.f32 %v704_v4 }
 0x541   :  { %v707_v6 = vsub.f32 1.0, %v706_v5 }
 0x542   :  { %v732_v22 = vor.u32 1.1754944e-38, %v731_v18  ;;  %vm730_vm12 = vcmp.eq.f32.partialorder %v729_v20, 8.507059e+37  ;;  %v967_v18 = vld [vmem:[#allocation10 + $0x28] sm:$0xff]  ;;  %v966_v20 = vld [vmem:[#allocation10 + $0x20] sm:$0xff] }
 0x543   :  { %v708_v8 = vmul.f32 %v1752_v3, %v707_v6 }
 0x545   :  { %v709_v10 = vadd.f32 %v1752_v3, %v708_v8 }
 0x546   :  { %v1754_v11 = vpop.eup %1753 }
 0x547   :  { %v713_v13 = vsel %vm712_vm7, %v1752_v3, %v709_v10  ;;  %v721_v14 = vmul.f32 %v1754_v11, %v704_v4  ;;  %vm726_vm9 = vweird.f32 %v1754_v11 }
 0x548   :  { %v718_v15 = vsel %vm715_vm8, %v717_v12, %v713_v13  ;;  %vm727_vm11 = vmor %vm725_vm10, %vm726_vm9 }
 0x549   :  { %v735_v16 = vmul.f32 %v718_v15, %v692_v54  ;;  %v722_v17 = vsub.f32 1.0, %v721_v14  ;;  %v1724_v14 = vld [vmem:[%s2596_s12 + $0x1] ss:$0 sm:$0xff] }
 0x54b   :  { %v723_v19 = vmul.f32 %v1754_v11, %v722_v17  ;;  %1629 = vmatmul.msk.f32.vlgmr.msra.gmra.mxu3 %vm380_vm5, %v735_v16  ;;  %v968_v16 = vld [vmem:[#allocation10 + $0x30] sm:$0xff] }
 0x54d   :  { %v724_v21 = vadd.f32 %v1754_v11, %v723_v19 }
 0x54f   :  { %v728_v23 = vsel %vm727_vm11, %v1754_v11, %v724_v21 }
 0x550   :  { %v733_v24 = vsel %vm730_vm12, %v732_v22, %v728_v23 }
 0x551   :  { %v736_v25 = vmul.f32 %v733_v24, %v695_v60 }
 0x553   :  { %1630 = vmatmul.msk.f32.gmra.mxu3 %vm380_vm5, %v736_v25 }
 0x5ce   :  { %v768_v30 = vpop.f32.mrf.mxu3 }
 0x5cf   :  { %v769_v32 = vadd.f32 %v1723_v27, %v768_v30 }
 0x5d1   :  { %v1631_v34 = vmul.f32 -1.442695, %v769_v32 }
 0x5d3   :  { %1755 = vpow2.f32 %v1631_v34 }
 0x5d6   :  { %v771_v56 = vpop.f32.mrf.mxu3 }
 0x5d7   :  { %v772_v35 = vadd.f32 %v1723_v27, %v771_v56 }
 0x5d9   :  { %v1756_v37 = vpop.eup %1755  ;;  %v1632_v38 = vmul.f32 -1.442695, %v772_v35 }
 0x5da   :  { %v780_v39 = vadd.f32 1.0, %v1756_v37 }
 0x5db   :  { %1757 = vpow2.f32 %v1632_v38 }
 0x5dc   :  { %1759 = vrcp.f32 %v780_v39  ;;  %v793_v46 = vand.u32 2147483648, %v780_v39  ;;  %v791_v48 = vand.u32 2147483647, %v780_v39  ;;  %vm787_vm14 = vweird.f32 %v780_v39 }
 0x5de   :  { %v794_v51 = vor.u32 1.1754944e-38, %v793_v46  ;;  %vm792_vm2 = vcmp.eq.f32.partialorder %v791_v48, 8.507059e+37 }
 0x5e1   :  { %v1758_v40 = vpop.eup %1757 }
 0x5e2   :  { %v1760_v42 = vpop.eup %1759  ;;  %v781_v43 = vadd.f32 1.0, %v1758_v40 }
 0x5e3   :  { %v783_v44 = vmul.f32 %v1760_v42, %v780_v39  ;;  %vm788_vm13 = vweird.f32 %v1760_v42  ;;  %v1725_v39 = vld [vmem:[%s2597_s13 + $0x1] ss:$0 sm:$0xff] }
 0x5e4   :  { %1761 = vrcp.f32 %v781_v43  ;;  %vm789_vm1 = vmor %vm787_vm14, %vm788_vm13  ;;  %v808_v62 = vand.u32 2147483648, %v781_v43  ;;  %v806_v2 = vand.u32 2147483647, %v781_v43  ;;  %vm802_vm7 = vweird.f32 %v781_v43 }
 0x5e5   :  { %v784_v45 = vsub.f32 1.0, %v783_v44  ;;  %v1726_v44 = vld [vmem:[%s2598_s14 + $0x1] ss:$0 sm:$0xff]  ;;  %s2643_s14 = sld [smem:[#allocation35_spill]] }
 0x5e6   :  { %v809_v4 = vor.u32 1.1754944e-38, %v808_v62  ;;  %vm807_vm9 = vcmp.eq.f32.partialorder %v806_v2, 8.507059e+37 }
 0x5e7   :  { %v785_v47 = vmul.f32 %v1760_v42, %v784_v45 }
 0x5e9   :  { %v786_v49 = vadd.f32 %v1760_v42, %v785_v47 }
 0x5ea   :  { %v1762_v50 = vpop.eup %1761 }
 0x5eb   :  { %v790_v53 = vsel %vm789_vm1, %v1760_v42, %v786_v49  ;;  %v798_v54 = vmul.f32 %v1762_v50, %v781_v43  ;;  %vm803_vm4 = vweird.f32 %v1762_v50 }
 0x5ec   :  { %v795_v55 = vsel %vm792_vm2, %v794_v51, %v790_v53  ;;  %vm804_vm8 = vmor %vm802_vm7, %vm803_vm4 }
 0x5ed   :  { %v812_v58 = vmul.f32 %v795_v55, %v769_v32  ;;  %v799_v60 = vsub.f32 1.0, %v798_v54 }
 0x5ef   :  { %v2393_v0 = vadd.f32 %v812_v58, %v2266_v36  ;;  %v800_v1 = vmul.f32 %v1762_v50, %v799_v60 }
 0x5f1   :  { %v801_v3 = vadd.f32 %v1762_v50, %v800_v1  ;;  %1637 = vmatmul.msk.f32.vlgmr.msra.gmra.mxu0 %vm380_vm5, %v2393_v0  ;;  %v1727_v1 = vld [vmem:[%s2600_s16 + $0x1] ss:$0 sm:$0xff]  ;;  %s1582_s16 = sshll.u32 %s2643_s14, 4  ;;  %s1583_s16 = int_to_ptr.hbm [resolvable:$true] %s1582_s16 }
 0x5f3   :  { %v805_v5 = vsel %vm804_vm8, %v1762_v50, %v801_v3 }
 0x5f4   :  { %v810_v6 = vsel %vm807_vm9, %v809_v4, %v805_v5 }
 0x5f5   :  { %v813_v7 = vmul.f32 %v810_v6, %v772_v35 }
 0x5f7   :  { %v2398_v8 = vadd.f32 %v813_v7, %v2270_v41 }
 0x5f9   :  { %1638 = vmatmul.msk.f32.gmra.mxu0 %vm380_vm5, %v2398_v8 }
 0x66e   :  { %v844_v36 = vpop.f32.mrf.mxu0 }
 0x676   :  { %v847_v9 = vpop.f32.mrf.mxu0 }
 0x677   :  { %v1709_v10 = vpack.i.bf16 %v844_v36, %v847_v9  ;;  %895 = vmatpush.msrb.mxu1 %v847_v9 }
 0x679   :  { %1710 = vrot.lane.b32.xlu2 %v1709_v10, %s2036_s8  ;;  %896 = vmatpush.msrb.mxu1 %v844_v36 }
 0x67a   :  { %1641 = vmatmul.msk.f32.vlgmr.msrb.gmra.mxu1 %vm418_vm6, %v2302_v61  ;;  %v969_v61 = vld [vmem:[#allocation10 + $0x38] sm:$0xff] }
 0x67b   :  { %993 = vmatpush.msrb.mxu3 %v969_v61 }
 0x67d   :  { %994 = vmatpush.msrb.mxu3 %v968_v16 }
 0x67f   :  { %995 = vmatpush.msrb.mxu3 %v967_v18 }
 0x681   :  { %996 = vmatpush.msrb.mxu3 %v966_v20 }
 0x682   :  { %1642 = vmatmul.msk.f32.gmra.mxu1 %vm418_vm6, %v2307_v63 }
 0x6d3   :  { %v1711_v11 = vpop.permute.xlu2 %1710 }
 0x6d4   :  { %v1712_v12 = vunpack.i.l.bf16 %v1711_v11  ;;  %v1713_v41 = vunpack.i.h.bf16 %v1711_v11 }
 0x6d6   :  { %872 = vmatpush.msrb.mxu2 %v1712_v12 }
 0x6d8   :  { %873 = vmatpush.msrb.mxu2 %v1713_v41 }
 0x6d9   :  { %1639 = vmatmul.msk.f32.vlgmr.msrb.gmra.mxu2 %vm418_vm6, %v2292_v57 }
 0x6e1   :  { %1640 = vmatmul.msk.f32.gmra.mxu2 %vm418_vm6, %v2297_v59 }
 0x6f7   :  { %v898_v13 = vpop.f32.mrf.mxu1 }
 0x6ff   :  { %v901_v57 = vpop.f32.mrf.mxu1 }
 0x75c   :  { %v875_v15 = vpop.f32.mrf.mxu2 }
 0x75d   :  { %v899_v63 = vadd.f32 %v898_v13, %v875_v15 }
 0x75f   :  { %v909_v17 = vadd.f32 %v1724_v14, %v899_v63 }
 0x761   :  { %v1644_v19 = vmul.f32 -1.442695, %v909_v17 }
 0x763   :  { %1763 = vpow2.f32 %v1644_v19 }
 0x764   :  { %v878_v59 = vpop.f32.mrf.mxu2 }
 0x765   :  { %v902_v21 = vadd.f32 %v901_v57, %v878_v59 }
 0x767   :  { %v910_v22 = vadd.f32 %v1724_v14, %v902_v21 }
 0x769   :  { %v1764_v23 = vpop.eup %1763  ;;  %v1645_v24 = vmul.f32 -1.442695, %v910_v22 }
 0x76a   :  { %v917_v25 = vadd.f32 1.0, %v1764_v23 }
 0x76b   :  { %1765 = vpow2.f32 %v1645_v24 }
 0x76c   :  { %1767 = vrcp.f32 %v917_v25  ;;  %v930_v32 = vand.u32 2147483648, %v917_v25  ;;  %v928_v34 = vand.u32 2147483647, %v917_v25  ;;  %vm924_vm10 = vweird.f32 %v917_v25 }
 0x76e   :  { %v931_v37 = vor.u32 1.1754944e-38, %v930_v32  ;;  %vm929_vm12 = vcmp.eq.f32.partialorder %v928_v34, 8.507059e+37  ;;  %v1661_v32 = vld [vmem:[%s2601_s17 + $0x68] sm:$0xff] }
 0x76f   :  { %v1657_v34 = vld [vmem:[%s2601_s17 + $0x48] sm:$0xff] }
 0x771   :  { %v1766_v26 = vpop.eup %1765 }
 0x772   :  { %v1768_v27 = vpop.eup %1767  ;;  %v918_v52 = vadd.f32 1.0, %v1766_v26 }
 0x773   :  { %v920_v29 = vmul.f32 %v1768_v27, %v917_v25  ;;  %vm925_vm6 = vweird.f32 %v1768_v27 }
 0x774   :  { %1769 = vrcp.f32 %v918_v52  ;;  %vm926_vm11 = vmor %vm924_vm10, %vm925_vm6  ;;  %v945_v46 = vand.u32 2147483648, %v918_v52  ;;  %v943_v49 = vand.u32 2147483647, %v918_v52  ;;  %vm939_vm14 = vweird.f32 %v918_v52 }
 0x775   :  { %v921_v30 = vsub.f32 1.0, %v920_v29  ;;  %v1663_v29 = vld [vmem:[%s2601_s17 + $0x78] sm:$0xff] }
 0x776   :  { %v946_v53 = vor.u32 1.1754944e-38, %v945_v46  ;;  %vm944_vm2 = vcmp.eq.f32.partialorder %v943_v49, 8.507059e+37  ;;  %1108 = vmatpush.msra.mxu2 %v1663_v29  ;;  %v1165_v46 = vld [vmem:[#allocation11 + $0x28] sm:$0xff] }
 0x777   :  { %v922_v33 = vmul.f32 %v1768_v27, %v921_v30  ;;  %v1662_v30 = vld [vmem:[%s2601_s17 + $0x70] sm:$0xff] }
 0x778   :  { %1109 = vmatpush.msra.mxu2 %v1662_v30 }
 0x779   :  { %v923_v56 = vadd.f32 %v1768_v27, %v922_v33  ;;  %v1658_v33 = vld [vmem:[%s2601_s17 + $0x50] sm:$0xff] }
 0x77a   :  { %v1770_v35 = vpop.eup %1769  ;;  %1110 = vmatpush.msra.mxu2 %v1661_v32 }
 0x77b   :  { %v927_v38 = vsel %vm926_vm11, %v1768_v27, %v923_v56  ;;  %v935_v40 = vmul.f32 %v1770_v35, %v918_v52  ;;  %vm940_vm13 = vweird.f32 %v1770_v35 }
 0x77c   :  { %v932_v42 = vsel %vm929_vm12, %v931_v37, %v927_v38  ;;  %vm941_vm1 = vmor %vm939_vm14, %vm940_vm13  ;;  %v1656_v37 = vld [vmem:[%s2601_s17 + $0x40] sm:$0xff] }
 0x77d   :  { %v949_v43 = vmul.f32 %v932_v42, %v909_v17  ;;  %v936_v45 = vsub.f32 1.0, %v935_v40 }
 0x77f   :  { %v956_v47 = vmul.f32 %v1725_v39, %v949_v43  ;;  %v937_v48 = vmul.f32 %v1770_v35, %v936_v45  ;;  %v1167_v43 = vld [vmem:[#allocation11 + $0x38] sm:$0xff]  ;;  %v1728_v45 = vld [vmem:[%s2602_s18 + $0x1] ss:$0 sm:$0xff] }
 0x780   :  { %1191 = vmatpush.msra.mxu1 %v1167_v43  ;;  %v1351_v43 = vld [vmem:[#allocation14 + $0xc8] sm:$0xff] }
 0x781   :  { %v963_v50 = vadd.f32 %v1726_v44, %v956_v47  ;;  %v938_v51 = vadd.f32 %v1770_v35, %v937_v48  ;;  %v1164_v47 = vld [vmem:[#allocation11 + $0x20] sm:$0xff] }
 0x783   :  { %v942_v54 = vsel %vm941_vm1, %v1770_v35, %v938_v51  ;;  %1649 = vmatmul.msk.f32.vlgmr.msrb.gmra.mxu3 %vm380_vm5, %v963_v50 }
 0x784   :  { %v947_v55 = vsel %vm944_vm2, %v946_v53, %v942_v54 }
 0x785   :  { %v950_v58 = vmul.f32 %v947_v55, %v910_v22 }
 0x787   :  { %v957_v60 = vmul.f32 %v1725_v39, %v950_v58 }
 0x789   :  { %v964_v62 = vadd.f32 %v1726_v44, %v957_v60  ;;  %v1166_v44 = vld [vmem:[#allocation11 + $0x30] sm:$0xff] }
 0x78a   :  { %1192 = vmatpush.msra.mxu1 %v1166_v44  ;;  %v1373_v44 = vld [vmem:[#allocation14 + $0x178] sm:$0xff] }
 0x78b   :  { %1650 = vmatmul.msk.f32.gmra.mxu3 %vm380_vm5, %v964_v62 }
 0x78c   :  { %1193 = vmatpush.msra.mxu1 %v1165_v46  ;;  %v1371_v46 = vld [vmem:[#allocation14 + $0x168] sm:$0xff] }
 0x78e   :  { %1194 = vmatpush.msra.mxu1 %v1164_v47  ;;  %v1348_v47 = vld [vmem:[#allocation14 + $0xb0] sm:$0xff] }
 0x806   :  { %v998_v2 = vpop.f32.mrf.mxu3 }
 0x807   :  { %v999_v3 = vadd.f32 %v1727_v1, %v998_v2 }
 0x809   :  { %v1651_v4 = vmul.f32 -1.442695, %v999_v3 }
 0x80b   :  { %1771 = vpow2.f32 %v1651_v4 }
 0x80e   :  { %v1001_v5 = vpop.f32.mrf.mxu3 }
 0x80f   :  { %v1002_v6 = vadd.f32 %v1727_v1, %v1001_v5 }
 0x811   :  { %v1772_v7 = vpop.eup %1771  ;;  %v1652_v36 = vmul.f32 -1.442695, %v1002_v6 }
 0x812   :  { %v1010_v9 = vadd.f32 1.0, %v1772_v7 }
 0x813   :  { %1773 = vpow2.f32 %v1652_v36 }
 0x814   :  { %1775 = vrcp.f32 %v1010_v9  ;;  %vm1017_vm7 = vweird.f32 %v1010_v9  ;;  %v1023_v17 = vand.u32 2147483648, %v1010_v9  ;;  %v1021_v19 = vand.u32 2147483647, %v1010_v9 }
 0x816   :  { %v1024_v22 = vor.u32 1.1754944e-38, %v1023_v17  ;;  %vm1022_vm11 = vcmp.eq.f32.partialorder %v1021_v19, 8.507059e+37 }
 0x819   :  { %v1774_v10 = vpop.eup %1773 }
 0x81a   :  { %v1776_v11 = vpop.eup %1775  ;;  %v1011_v12 = vadd.f32 1.0, %v1774_v10 }
 0x81b   :  { %v1013_v41 = vmul.f32 %v1776_v11, %v1010_v9  ;;  %vm1018_vm4 = vweird.f32 %v1776_v11 }
 0x81c   :  { %1777 = vrcp.f32 %v1011_v12  ;;  %v1038_v18 = vand.u32 2147483648, %v1011_v12  ;;  %v1036_v57 = vand.u32 2147483647, %v1011_v12  ;;  %vm1019_vm9 = vmor %vm1017_vm7, %vm1018_vm4  ;;  %vm1032_vm6 = vweird.f32 %v1011_v12 }
 0x81d   :  { %v1014_v13 = vsub.f32 1.0, %v1013_v41 }
 0x81e   :  { %v1039_v23 = vor.u32 1.1754944e-38, %v1038_v18  ;;  %vm1037_vm12 = vcmp.eq.f32.partialorder %v1036_v57, 8.507059e+37  ;;  %v1251_v57 = vld [vmem:[#allocation13 + $0x38] sm:$0xff] }
 0x81f   :  { %v1015_v14 = vmul.f32 %v1776_v11, %v1014_v13 }
 0x821   :  { %v1016_v63 = vadd.f32 %v1776_v11, %v1015_v14 }
 0x822   :  { %v1778_v61 = vpop.eup %1777 }
 0x823   :  { %v1028_v15 = vmul.f32 %v1778_v61, %v1011_v12  ;;  %vm1033_vm8 = vweird.f32 %v1778_v61  ;;  %v1020_v59 = vsel %vm1019_vm9, %v1776_v11, %v1016_v63 }
 0x824   :  { %vm1034_vm10 = vmor %vm1032_vm6, %vm1033_vm8  ;;  %v1025_v25 = vsel %vm1022_vm11, %v1024_v22, %v1020_v59  ;;  %v1729_v59 = vld [vmem:[%s2604_s20 + $0x1] ss:$0 sm:$0xff]  ;;  %v1249_v22 = vld [vmem:[#allocation13 + $0x28] sm:$0xff]  ;;  %s2039_s20 = smov [#allocation16]  }
 0x825   :  { %v1029_v16 = vsub.f32 1.0, %v1028_v15  ;;  %v1042_v52 = vmul.f32 %v1025_v25, %v999_v3  ;;  %s1580_s5 = sshll.u32 %s2039_s20, 4  ;;  %s1581_s5 = int_to_ptr.vmem [resolvable:$true] %s1580_s5 }
 0x827   :  { %v1030_v20 = vmul.f32 %v1778_v61, %v1029_v16 }
 0x829   :  { %v1031_v21 = vadd.f32 %v1778_v61, %v1030_v20  ;;  %v1250_v20 = vld [vmem:[#allocation13 + $0x30] sm:$0xff] }
 0x82a   :  { %1276 = vmatpush.msra.mxu3 %v1250_v20 }
 0x82b   :  { %v1035_v24 = vsel %vm1034_vm10, %v1778_v61, %v1031_v21  ;;  %v1248_v21 = vld [vmem:[#allocation13 + $0x20] sm:$0xff] }
 0x82c   :  { %v1040_v26 = vsel %vm1037_vm12, %v1039_v23, %v1035_v24  ;;  %1277 = vmatpush.msra.mxu3 %v1248_v21  ;;  %v1246_v23 = vld [vmem:[#allocation13 + $0x10] sm:$0xff]  ;;  %v1247_v24 = vld [vmem:[#allocation13 + $0x18] sm:$0xff] }
 0x82d   :  { %v1043_v27 = vmul.f32 %v1040_v26, %v1002_v6 }
 0x82e   :  { %1278 = vmatpush.msra.mxu3 %v1246_v23 }
 0x82f   :  { %1653 = vmatpush.msk.msrb.mxu0 %vm619_vm15, %v1043_v27  ;;  %v1244_v27 = vld [vmem:[#allocation13] sm:$0xff] }
 0x830   :  { %1279 = vmatpush.msra.mxu3 %v1244_v27  ;;  %v1365_v27 = vld [vmem:[#allocation14 + $0x138] sm:$0xff] }
 0x831   :  { %1062 = vmatpush.msrb.mxu0 %v1042_v52  ;;  %v1245_v52 = vld [vmem:[#allocation13 + $0x8] sm:$0xff] }
 0x832   :  { %1654 = vmatmul.msk.f32.vlgmr.msrb.gmra.mxu0 %vm612_vm0, %v2331_v28  ;;  %v1660_v28 = vld [vmem:[%s2601_s17 + $0x60] sm:$0xff] }
 0x833   :  { %1111 = vmatpush.msra.mxu2 %v1660_v28  ;;  %1299 = vmatpush.msra.mxu0 %v1251_v57 }
 0x835   :  { %1300 = vmatpush.msra.mxu0 %v1249_v22 }
 0x837   :  { %1301 = vmatpush.msra.mxu0 %v1247_v24 }
 0x839   :  { %1302 = vmatpush.msra.mxu0 %v1245_v52  ;;  %v1336_v52 = vld [vmem:[#allocation14 + $0x50] sm:$0xff] }
 0x83a   :  { %1655 = vmatmul.msk.f32.gmra.mxu0 %vm612_vm0, %v2336_v31  ;;  %v1659_v31 = vld [vmem:[%s2601_s17 + $0x58] sm:$0xff] }
 0x83b   :  { %1112 = vmatpush.msra.mxu2 %v1659_v31  ;;  %1463 = vmatpush.msrb.mxu0 %v1373_v44  ;;  %v1327_v44 = vld [vmem:[#allocation14 + $0x8] sm:$0xff] }
 0x83d   :  { %1113 = vmatpush.msra.mxu2 %v1658_v33  ;;  %v1356_v33 = vld [vmem:[#allocation14 + $0xf0] sm:$0xff]  ;;  %1464 = vmatpush.msrb.mxu0 %v1371_v46  ;;  %v1508_v46 = vld [vmem:[%s2609_s25 + $0x70] sm:$0xff] }
 0x83f   :  { %1114 = vmatpush.msra.mxu2 %v1657_v34  ;;  %v1357_v34 = vld [vmem:[#allocation14 + $0xf8] sm:$0xff] }
 0x840   :  { %1432 = vmatpush.msrb.mxu3 %v1357_v34  ;;  %v1332_v34 = vld [vmem:[#allocation14 + $0x30] sm:$0xff] }
 0x841   :  { %1115 = vmatpush.msra.mxu2 %v1656_v37  ;;  %v1355_v37 = vld [vmem:[#allocation14 + $0xe8] sm:$0xff] }
 0x842   :  { %1433 = vmatpush.msrb.mxu3 %v1355_v37  ;;  %v1359_v37 = vld [vmem:[#allocation14 + $0x108] sm:$0xff] }
 0x843   :  { %1386 = vmatpush.msrb.mxu2 %v1356_v33  ;;  %v1361_v33 = vld [vmem:[#allocation14 + $0x118] sm:$0xff] }
 0x8af   :  { %v1064_v56 = vpop.f32.mrf.mxu0 }
 0x8b0   :  { %1072 = vrot.lane.b32.xlu0 %v1064_v56, %s2038_s11  ;;  %v1354_v56 = vld [vmem:[#allocation14 + $0xe0] sm:$0xff] }
 0x8b1   :  { %1387 = vmatpush.msrb.mxu2 %v1354_v56  ;;  %v1358_v56 = vld [vmem:[#allocation14 + $0x100] sm:$0xff] }
 0x8b7   :  { %v1067_v35 = vpop.f32.mrf.mxu0 }
 0x8b8   :  { %1074 = vrot.lane.b32.xlu1 %v1067_v35, %s2038_s11 }
 0x922   :  { %v1073_v38 = vpop.permute.xlu0 %1072 }
 0x923   :  { %v1078_v39 = vsel %vm380_vm5, %v2393_v0, %v1073_v38  ;;  %v1352_v38 = vld [vmem:[#allocation14 + $0xd0] sm:$0xff] }
 0x924   :  { %1665 = vmatmul.msk.f32.vlgmr.msra.gmra.mxu2 %vm283_vm3, %v1078_v39  ;;  %v1353_v39 = vld [vmem:[#allocation14 + $0xd8] sm:$0xff] }
 0x925   :  { %1388 = vmatpush.msrb.mxu2 %v1352_v38  ;;  %1434 = vmatpush.msrb.mxu3 %v1353_v39  ;;  %v1330_v38 = vld [vmem:[#allocation14 + $0x20] sm:$0xff]  ;;  %v1331_v39 = vld [vmem:[#allocation14 + $0x28] sm:$0xff] }
 0x927   :  { %1435 = vmatpush.msrb.mxu3 %v1351_v43  ;;  %v1326_v43 = vld [vmem:[#allocation14] sm:$0xff] }
 0x92a   :  { %v1075_v40 = vpop.permute.xlu1 %1074 }
 0x92b   :  { %v1079_v42 = vsel %vm380_vm5, %v2398_v8, %v1075_v40  ;;  %v1372_v40 = vld [vmem:[#allocation14 + $0x170] sm:$0xff] }
 0x92c   :  { %1666 = vmatmul.msk.f32.gmra.mxu2 %vm283_vm3, %v1079_v42  ;;  %v1350_v42 = vld [vmem:[#allocation14 + $0xc0] sm:$0xff]  ;;  %1417 = vmatpush.msrb.mxu1 %v1372_v40  ;;  %v1328_v40 = vld [vmem:[#allocation14 + $0x10] sm:$0xff] }
 0x92d   :  { %1389 = vmatpush.msrb.mxu2 %v1350_v42  ;;  %v1329_v42 = vld [vmem:[#allocation14 + $0x18] sm:$0xff] }
 0x92f   :  { %1390 = vmatpush.msrb.mxu2 %v1348_v47  ;;  %v1507_v47 = vld [vmem:[%s2609_s25 + $0x68] sm:$0xff] }
 0x9a7   :  { %v1117_v48 = vpop.f32.mrf.mxu2 }
 0x9a8   :  { %v1118_v49 = vadd.f32 %v1728_v45, %v1117_v48  ;;  %v1349_v48 = vld [vmem:[#allocation14 + $0xb8] sm:$0xff] }
 0x9a9   :  { %1436 = vmatpush.msrb.mxu3 %v1349_v48  ;;  %v1252_v48 = vld [vmem:[%s2606_s22] sm:$0x3] }
 0x9aa   :  { %v1667_v50 = vmul.f32 -1.442695, %v1118_v49 }
 0x9ac   :  { %1779 = vpow2.f32 %v1667_v50  ;;  %v1369_v50 = vld [vmem:[#allocation14 + $0x158] sm:$0xff] }
 0x9ad   :  { %1465 = vmatpush.msrb.mxu0 %v1369_v50  ;;  %v1505_v50 = vld [vmem:[%s2609_s25 + $0x58] sm:$0xff] }
 0x9af   :  { %v1120_v51 = vpop.f32.mrf.mxu2 }
 0x9b0   :  { %v1121_v53 = vadd.f32 %v1728_v45, %v1120_v51  ;;  %v1370_v45 = vld [vmem:[#allocation14 + $0x160] sm:$0xff] }
 0x9b1   :  { %1418 = vmatpush.msrb.mxu1 %v1370_v45  ;;  %v1366_v51 = vld [vmem:[#allocation14 + $0x140] sm:$0xff]  ;;  %v1509_v45 = vld [vmem:[%s2609_s25 + $0x78] sm:$0xff] }
 0x9b2   :  { %v1780_v54 = vpop.eup %1779  ;;  %v1668_v55 = vmul.f32 -1.442695, %v1121_v53 }
 0x9b3   :  { %v1129_v58 = vadd.f32 1.0, %v1780_v54  ;;  %v1346_v54 = vld [vmem:[#allocation14 + $0xa0] sm:$0xff] }
 0x9b4   :  { %1781 = vpow2.f32 %v1668_v55  ;;  %v1347_v55 = vld [vmem:[#allocation14 + $0xa8] sm:$0xff]  ;;  %1391 = vmatpush.msrb.mxu2 %v1346_v54 }
 0x9b5   :  { %1783 = vrcp.f32 %v1129_v58  ;;  %v1142_v4 = vand.u32 2147483648, %v1129_v58  ;;  %v1140_v6 = vand.u32 2147483647, %v1129_v58  ;;  %vm1136_vm0 = vweird.f32 %v1129_v58  ;;  %1437 = vmatpush.msrb.mxu3 %v1347_v55 }
 0x9b7   :  { %v1143_v9 = vor.u32 1.1754944e-38, %v1142_v4  ;;  %vm1141_vm14 = vcmp.eq.f32.partialorder %v1140_v6, 8.507059e+37  ;;  %v1343_v6 = vld [vmem:[#allocation14 + $0x88] sm:$0xff] }
 0x9ba   :  { %v1782_v60 = vpop.eup %1781 }
 0x9bb   :  { %v1784_v62 = vpop.eup %1783  ;;  %v1130_v1 = vadd.f32 1.0, %v1782_v60 }
 0x9bc   :  { %v1132_v2 = vmul.f32 %v1784_v62, %v1129_v58  ;;  %vm1137_vm15 = vweird.f32 %v1784_v62 }
 0x9bd   :  { %1785 = vrcp.f32 %v1130_v1  ;;  %vm1138_vm13 = vmor %vm1136_vm0, %vm1137_vm15  ;;  %v1157_v14 = vand.u32 2147483648, %v1130_v1  ;;  %v1155_v15 = vand.u32 2147483647, %v1130_v1  ;;  %vm1151_vm2 = vweird.f32 %v1130_v1 }
 0x9be   :  { %v1133_v3 = vsub.f32 1.0, %v1132_v2  ;;  %v1344_v2 = vld [vmem:[#allocation14 + $0x90] sm:$0xff] }
 0x9bf   :  { %v1158_v16 = vor.u32 1.1754944e-38, %v1157_v14  ;;  %vm1156_vm7 = vcmp.eq.f32.partialorder %v1155_v15, 8.507059e+37  ;;  %1392 = vmatpush.msrb.mxu2 %v1344_v2 }
 0x9c0   :  { %v1134_v5 = vmul.f32 %v1784_v62, %v1133_v3  ;;  %v1345_v3 = vld [vmem:[#allocation14 + $0x98] sm:$0xff] }
 0x9c1   :  { %1438 = vmatpush.msrb.mxu3 %v1345_v3 }
 0x9c2   :  { %v1135_v7 = vadd.f32 %v1784_v62, %v1134_v5  ;;  %v1342_v5 = vld [vmem:[#allocation14 + $0x80] sm:$0xff] }
 0x9c3   :  { %v1786_v36 = vpop.eup %1785  ;;  %1393 = vmatpush.msrb.mxu2 %v1342_v5  ;;  %1439 = vmatpush.msrb.mxu3 %v1343_v6 }
 0x9c4   :  { %v1139_v10 = vsel %vm1138_vm13, %v1784_v62, %v1135_v7  ;;  %v1147_v11 = vmul.f32 %v1786_v36, %v1130_v1  ;;  %vm1152_vm1 = vweird.f32 %v1786_v36  ;;  %v1367_v62 = vld [vmem:[#allocation14 + $0x148] sm:$0xff] }
 0x9c5   :  { %v1144_v12 = vsel %vm1141_vm14, %v1143_v9, %v1139_v10  ;;  %vm1153_vm4 = vmor %vm1151_vm2, %vm1152_vm1  ;;  %1466 = vmatpush.msrb.mxu0 %v1367_v62  ;;  %v1340_v10 = vld [vmem:[#allocation14 + $0x70] sm:$0xff] }
 0x9c6   :  { %v1161_v41 = vmul.f32 %v1144_v12, %v1118_v49  ;;  %v1148_v13 = vsub.f32 1.0, %v1147_v11  ;;  %v1368_v49 = vld [vmem:[#allocation14 + $0x150] sm:$0xff]  ;;  %v1341_v11 = vld [vmem:[#allocation14 + $0x78] sm:$0xff]  ;;  %1394 = vmatpush.msrb.mxu2 %v1340_v10 }
 0x9c7   :  { %1419 = vmatpush.msrb.mxu1 %v1368_v49  ;;  %1440 = vmatpush.msrb.mxu3 %v1341_v11  ;;  %v1506_v49 = vld [vmem:[%s2609_s25 + $0x60] sm:$0xff] }
 0x9c8   :  { %v1149_v61 = vmul.f32 %v1786_v36, %v1148_v13  ;;  %1670 = vmatmul.msk.f32.vlgmr.msra.gmra.mxu1 %vm380_vm5, %v1161_v41  ;;  %1467 = vmatpush.msrb.mxu0 %v1365_v27  ;;  %v1494_v27 = vld [vmem:[%s2609_s25] sm:$0xff] }
 0x9c9   :  { %1420 = vmatpush.msrb.mxu1 %v1366_v51  ;;  %v1255_v51 = vperm.slane %v1252_v48, 1 }
 0x9ca   :  { %v1150_v63 = vadd.f32 %v1786_v36, %v1149_v61 }
 0x9cc   :  { %v1154_v17 = vsel %vm1153_vm4, %v1786_v36, %v1150_v63 }
 0x9cd   :  { %v1159_v18 = vsel %vm1156_vm7, %v1158_v16, %v1154_v17 }
 0x9ce   :  { %v1162_v19 = vmul.f32 %v1159_v18, %v1121_v53 }
 0x9d0   :  { %1671 = vmatmul.msk.f32.gmra.mxu1 %vm380_vm5, %v1162_v19 }
 0xa45   :  { %v1196_v25 = vpop.f32.mrf.mxu1 }
 0xa46   :  { %v2470_v26 = vadd.f32 %v1729_v59, %v1196_v25  ;;  %v1364_v25 = vld [vmem:[#allocation14 + $0x130] sm:$0xff] }
 0xa47   :  { %1421 = vmatpush.msrb.mxu1 %v1364_v25  ;;  %v1495_v25 = vld [vmem:[%s2609_s25 + $0x8] sm:$0xff] }
 0xa48   :  { %v1672_v29 = vmul.f32 -1.442695, %v2470_v26 }
 0xa4a   :  { %1787 = vpow2.f32 %v1672_v29  ;;  %v1362_v29 = vld [vmem:[#allocation14 + $0x120] sm:$0xff] }
 0xa4b   :  { %1422 = vmatpush.msrb.mxu1 %v1362_v29  ;;  %v1374_v29 = vld [vmem:[%s2608_s24] sm:$0x3] }
 0xa4d   :  { %v1199_v30 = vpop.f32.mrf.mxu1 }
 0xa4e   :  { %v2473_v32 = vadd.f32 %v1729_v59, %v1199_v30  ;;  %v1337_v30 = vld [vmem:[#allocation14 + $0x58] sm:$0xff] }
 0xa50   :  { %v1788_v28 = vpop.eup %1787  ;;  %v1673_v31 = vmul.f32 -1.442695, %v2473_v32 }
 0xa51   :  { %v2476_v35 = vadd.f32 1.0, %v1788_v28  ;;  %v1360_v28 = vld [vmem:[#allocation14 + $0x110] sm:$0xff] }
 0xa52   :  { %1789 = vpow2.f32 %v1673_v31  ;;  %v1335_v31 = vld [vmem:[#allocation14 + $0x48] sm:$0xff]  ;;  %1423 = vmatpush.msrb.mxu1 %v1360_v28 }
 0xa53   :  { %1791 = vrcp.f32 %v2476_v35  ;;  %v1221_v7 = vand.u32 2147483648, %v2476_v35  ;;  %v1219_v9 = vand.u32 2147483647, %v2476_v35  ;;  %vm1215_vm9 = vweird.f32 %v2476_v35 }
 0xa54   :  { %1424 = vmatpush.msrb.mxu1 %v1358_v56 }
 0xa55   :  { %v1222_v13 = vor.u32 1.1754944e-38, %v1221_v7  ;;  %vm1220_vm10 = vcmp.eq.f32.partialorder %v1219_v9, 8.507059e+37 }
 0xa56   :  { %1528 = vmatpush.msra.mxu1 %v1509_v45 }
 0xa58   :  { %v1790_v53 = vpop.eup %1789  ;;  %1529 = vmatpush.msra.mxu1 %v1508_v46 }
 0xa59   :  { %v1792_v58 = vpop.eup %1791  ;;  %v1209_v60 = vadd.f32 1.0, %v1790_v53 }
 0xa5a   :  { %v1211_v1 = vmul.f32 %v1792_v58, %v2476_v35  ;;  %vm1216_vm8 = vweird.f32 %v1792_v58  ;;  %v1333_v35 = vld [vmem:[#allocation14 + $0x38] sm:$0xff]  ;;  %1530 = vmatpush.msra.mxu1 %v1507_v47 }
 0xa5b   :  { %1793 = vrcp.f32 %v1209_v60  ;;  %vm1217_vm6 = vmor %vm1215_vm9, %vm1216_vm8  ;;  %v1236_v17 = vand.u32 2147483648, %v1209_v60  ;;  %v1234_v20 = vand.u32 2147483647, %v1209_v60  ;;  %vm1230_vm12 = vweird.f32 %v1209_v60 }
 0xa5c   :  { %v1212_v4 = vsub.f32 1.0, %v1211_v1  ;;  %1531 = vmatpush.msra.mxu1 %v1506_v49 }
 0xa5d   :  { %v1237_v59 = vor.u32 1.1754944e-38, %v1236_v17  ;;  %vm1235_vm0 = vcmp.eq.f32.partialorder %v1234_v20, 8.507059e+37  ;;  %v1501_v17 = vld [vmem:[%s2609_s25 + $0x38] sm:$0xff]  ;;  %v1499_v20 = vld [vmem:[%s2609_s25 + $0x28] sm:$0xff] }
 0xa5e   :  { %v1213_v36 = vmul.f32 %v1792_v58, %v1212_v4  ;;  %1532 = vmatpush.msra.mxu1 %v1505_v50 }
 0xa60   :  { %v1214_v12 = vadd.f32 %v1792_v58, %v1213_v36 }
 0xa61   :  { %v1794_v41 = vpop.eup %1793 }
 0xa62   :  { %v1218_v14 = vsel %vm1217_vm6, %v1792_v58, %v1214_v12  ;;  %v1226_v61 = vmul.f32 %v1794_v41, %v1209_v60  ;;  %vm1231_vm11 = vweird.f32 %v1794_v41  ;;  %v1254_v58 = vperm.slane %v1252_v48, 0 }
 0xa63   :  { %v1223_v15 = vsel %vm1220_vm10, %v1222_v13, %v1218_v14  ;;  %vm1232_vm15 = vmor %vm1230_vm12, %vm1231_vm11 }
 0xa64   :  { %v1240_v63 = vmul.f32 %v1223_v15, %v2470_v26  ;;  %v1227_v16 = vsub.f32 1.0, %v1226_v61  ;;  %v1339_v26 = vld [vmem:[#allocation14 + $0x68] sm:$0xff]  ;;  %v1503_v15 = vld [vmem:[%s2609_s25 + $0x48] sm:$0xff] }
 0xa65   :  { %1441 = vmatpush.msrb.mxu3 %v1339_v26  ;;  %v1504_v61 = vld [vmem:[%s2609_s25 + $0x50] sm:$0xff]  ;;  %v1511_v26 = vld [vmem:[%s2609_s25 + $0x88] sm:$0xff] }
 0xa66   :  { %v1242_v18 = vadd.f32 %v1240_v63, %v2393_v0  ;;  %v1228_v19 = vmul.f32 %v1794_v41, %v1227_v16  ;;  %v1338_v0 = vld [vmem:[#allocation14 + $0x60] sm:$0xff]  ;;  %1533 = vmatpush.msra.mxu1 %v1504_v61  ;;  %v1517_v63 = vld [vmem:[%s2609_s25 + $0xb8] sm:$0xff]  ;;  %v1502_v16 = vld [vmem:[%s2609_s25 + $0x40] sm:$0xff] }
 0xa67   :  { %1395 = vmatpush.msrb.mxu2 %v1338_v0  ;;  %1442 = vmatpush.msrb.mxu3 %v1337_v30  ;;  %v1512_v0 = vld [vmem:[%s2609_s25 + $0x90] sm:$0xff]  ;;  %v1376_v30 = vperm.slane %v1374_v29, 0 }
 0xa68   :  { %v1229_v57 = vadd.f32 %v1794_v41, %v1228_v19  ;;  %1674 = vmatmul.msk.f32.vlgmr.msra.gmra.mxu3 %vm380_vm5, %v1242_v18  ;;  %1676 = vmatmul.msk.f32.vlgmr.msra.gmra.mxu0 %vm380_vm5, %v1242_v18  ;;  %v1500_v18 = vld [vmem:[%s2609_s25 + $0x30] sm:$0xff] }
 0xa69   :  { %1396 = vmatpush.msrb.mxu2 %v1336_v52  ;;  %1443 = vmatpush.msrb.mxu3 %v1335_v31  ;;  %v1516_v19 = vld [vmem:[%s2609_s25 + $0xb0] sm:$0xff]  ;;  %v1510_v52 = vld [vmem:[%s2609_s25 + $0x80] sm:$0xff] }
 0xa6a   :  { %v1233_v21 = vsel %vm1232_vm15, %v1794_v41, %v1229_v57  ;;  %1534 = vmatpush.msra.mxu1 %v1503_v15  ;;  %v1515_v57 = vld [vmem:[%s2609_s25 + $0xa8] sm:$0xff] }
 0xa6b   :  { %v1238_v22 = vsel %vm1235_vm0, %v1237_v59, %v1233_v21  ;;  %1444 = vmatpush.msrb.mxu3 %v1333_v35  ;;  %v1498_v59 = vld [vmem:[%s2609_s25 + $0x20] sm:$0xff] }
 0xa6c   :  { %v1241_v23 = vmul.f32 %v1238_v22, %v2473_v32  ;;  %v1363_v32 = vld [vmem:[#allocation14 + $0x128] sm:$0xff]  ;;  %1535 = vmatpush.msra.mxu1 %v1502_v16  ;;  %v1514_v21 = vld [vmem:[%s2609_s25 + $0xa0] sm:$0xff] }
 0xa6d   :  { %1468 = vmatpush.msrb.mxu0 %v1363_v32  ;;  %1445 = vmatpush.msrb.mxu3 %v1331_v39  ;;  %v1497_v22 = vld [vmem:[%s2609_s25 + $0x18] sm:$0xff]  ;;  %v1377_v32 = vperm.slane %v1374_v29, 1 }
 0xa6e   :  { %v1243_v24 = vadd.f32 %v1241_v23, %v2398_v8  ;;  %v1334_v8 = vld [vmem:[#allocation14 + $0x40] sm:$0xff]  ;;  %1536 = vmatpush.msra.mxu1 %v1501_v17  ;;  %v1513_v23 = vld [vmem:[%s2609_s25 + $0x98] sm:$0xff] }
 0xa6f   :  { %1397 = vmatpush.msrb.mxu2 %v1334_v8  ;;  %1469 = vmatpush.msrb.mxu0 %v1361_v33 }
 0xa70   :  { %1675 = vmatmul.msk.f32.gmra.mxu3 %vm380_vm5, %v1243_v24  ;;  %1677 = vmatmul.msk.f32.gmra.mxu0 %vm380_vm5, %v1243_v24  ;;  %v1496_v24 = vld [vmem:[%s2609_s25 + $0x10] sm:$0xff] }
 0xa71   :  { %1398 = vmatpush.msrb.mxu2 %v1332_v34  ;;  %1470 = vmatpush.msrb.mxu0 %v1359_v37 }
 0xa72   :  { %1446 = vmatpush.msrb.mxu3 %v1329_v42  ;;  %1537 = vmatpush.msra.mxu1 %v1500_v18 }
 0xa73   :  { %1399 = vmatpush.msrb.mxu2 %v1330_v38  ;;  %1559 = vmatpush.msra.mxu0 %v1517_v63 }
 0xa74   :  { %1447 = vmatpush.msrb.mxu3 %v1327_v44  ;;  %1538 = vmatpush.msra.mxu1 %v1499_v20 }
 0xa75   :  { %1400 = vmatpush.msrb.mxu2 %v1328_v40  ;;  %1560 = vmatpush.msra.mxu0 %v1516_v19 }
 0xa76   :  { %1539 = vmatpush.msra.mxu1 %v1498_v59 }
 0xa77   :  { %1401 = vmatpush.msrb.mxu2 %v1326_v43  ;;  %1561 = vmatpush.msra.mxu0 %v1515_v57 }
 0xa78   :  { %1540 = vmatpush.msra.mxu1 %v1497_v22 }
 0xa79   :  { %1562 = vmatpush.msra.mxu0 %v1514_v21 }
 0xa7a   :  { %1541 = vmatpush.msra.mxu1 %v1496_v24 }
 0xa7b   :  { %1563 = vmatpush.msra.mxu0 %v1513_v23 }
 0xa7c   :  { %1542 = vmatpush.msra.mxu1 %v1495_v25 }
 0xa7d   :  { %1564 = vmatpush.msra.mxu0 %v1512_v0 }
 0xa7e   :  { %1543 = vmatpush.msra.mxu1 %v1494_v27 }
 0xa7f   :  { %1565 = vmatpush.msra.mxu0 %v1511_v26 }
 0xa81   :  { %1566 = vmatpush.msra.mxu0 %v1510_v52 }
 0xae5   :  { %v1304_v53 = vpop.f32.mrf.mxu0 }
 0xae6   :  { %v1305_v54 = vadd.f32 %v1304_v53, %v1255_v51 }
 0xae8   :  { %vm1311_vm5 = vcmp.gt.f32.partialorder %v1305_v54, 0.0  ;;  %v1315_v55 = vmul.f32 0.01, %v1305_v54 }
 0xaea   :  { %v1319_v60 = vsel %vm1311_vm5, %v1305_v54, %v1315_v55 }
 0xaeb   :  { %v1323_v62 = vadd.f32 %v1319_v60, %v1305_v54  ;;  %v1281_v1 = vpop.f32.mrf.mxu3 }
 0xaec   :  { %v1282_v2 = vadd.f32 %v1281_v1, %v1254_v58 }
 0xaed   :  { %v1307_v3 = vpop.f32.mrf.mxu0  ;;  %1678 = vmatmul.msk.f32.vlgmr.msrb.gmra.mxu1 %vm283_vm3, %v1323_v62  ;;  %1680 = vmatmul.msk.f32.vlgmr.msrb.gmra.mxu0 %vm283_vm3, %v1323_v62 }
 0xaee   :  { %vm1310_vm13 = vcmp.gt.f32.partialorder %v1282_v2, 0.0  ;;  %v1314_v4 = vmul.f32 0.01, %v1282_v2  ;;  %v1308_v5 = vadd.f32 %v1307_v3, %v1255_v51 }
 0xaf0   :  { %v1317_v6 = vmul.f32 0.01, %v1308_v5  ;;  %v1318_v7 = vsel %vm1310_vm13, %v1282_v2, %v1314_v4  ;;  %vm1313_vm14 = vcmp.gt.f32.partialorder %v1308_v5, 0.0 }
 0xaf1   :  { %v1322_v36 = vadd.f32 %v1318_v7, %v1282_v2  ;;  %v1730_v2 = vld [vmem:[%s2610_s26] ss:$0 sm:$0xff] }
 0xaf2   :  { %v1321_v9 = vsel %vm1313_vm14, %v1308_v5, %v1317_v6 }
 0xaf3   :  { %v1284_v10 = vpop.f32.mrf.mxu3  ;;  %1402 = vmatmul.f32.vlgmr.msrb.gmra.mxu2 %v1322_v36  ;;  %1448 = vmatmul.f32.vlgmr.msrb.gmra.mxu3 %v1322_v36  ;;  %v1325_v11 = vadd.f32 %v1321_v9, %v1308_v5 }
 0xaf4   :  { %v1285_v12 = vadd.f32 %v1284_v10, %v1254_v58 }
 0xaf5   :  { %1679 = vmatmul.msk.f32.gmra.mxu1 %vm283_vm3, %v1325_v11  ;;  %1681 = vmatmul.msk.f32.gmra.mxu0 %vm283_vm3, %v1325_v11 }
 0xaf6   :  { %vm1312_vm1 = vcmp.gt.f32.partialorder %v1285_v12, 0.0  ;;  %v1316_v41 = vmul.f32 0.01, %v1285_v12 }
 0xaf8   :  { %v1320_v13 = vsel %vm1312_vm1, %v1285_v12, %v1316_v41 }
 0xaf9   :  { %v1324_v14 = vadd.f32 %v1320_v13, %v1285_v12 }
 0xafb   :  { %1405 = vmatmul.f32.gmra.mxu2 %v1324_v14  ;;  %1451 = vmatmul.f32.gmra.mxu3 %v1324_v14 }
 0xb6a   :  { %v1426_v8 = vpop.f32.mrf.mxu1  ;;  %v1472_v28 = vpop.f32.mrf.mxu0 }
 0xb72   :  { %v1429_v49 = vpop.f32.mrf.mxu1  ;;  %v1475_v50 = vpop.f32.mrf.mxu0 }
 0xb76   :  { %v1403_v31 = vpop.f32.mrf.mxu2  ;;  %v1449_v33 = vpop.f32.mrf.mxu3 }
 0xb77   :  { %v1404_v34 = vadd.f32 %v1403_v31, %v1376_v30  ;;  %v1450_v56 = vadd.f32 %v1449_v33, %v1377_v32 }
 0xb79   :  { %v1427_v35 = vadd.f32 %v1426_v8, %v1404_v34  ;;  %v1473_v37 = vadd.f32 %v1472_v28, %v1450_v56 }
 0xb7b   :  { %vm1478_vm2 = vcmp.gt.f32.partialorder %v1427_v35, 0.0  ;;  %v1482_v38 = vmul.f32 0.01, %v1427_v35  ;;  %vm1479_vm4 = vcmp.gt.f32.partialorder %v1473_v37, 0.0  ;;  %v1483_v39 = vmul.f32 0.01, %v1473_v37 }
 0xb7d   :  { %v1487_v40 = vsel %vm1479_vm4, %v1473_v37, %v1483_v39  ;;  %v1486_v42 = vsel %vm1478_vm2, %v1427_v35, %v1482_v38 }
 0xb7e   :  { %v1491_v43 = vadd.f32 %v1487_v40, %v1473_v37  ;;  %v1406_v44 = vpop.f32.mrf.mxu2  ;;  %v1452_v45 = vpop.f32.mrf.mxu3  ;;  %v1490_v46 = vadd.f32 %v1486_v42, %v1427_v35 }
 0xb7f   :  { %v1407_v47 = vadd.f32 %v1406_v44, %v1376_v30  ;;  %v1453_v48 = vadd.f32 %v1452_v45, %v1377_v32 }
 0xb80   :  { %1544 = vmatmul.f32.vlgmr.msra.gmra.mxu1 %v1490_v46  ;;  %1682 = vmatmul.msk.f32.vlgmr.msra.gmra.mxu0 %vm283_vm3, %v1491_v43 }
 0xb81   :  { %v1430_v51 = vadd.f32 %v1429_v49, %v1407_v47  ;;  %v1476_v53 = vadd.f32 %v1475_v50, %v1453_v48 }
 0xb83   :  { %vm1480_vm7 = vcmp.gt.f32.partialorder %v1430_v51, 0.0  ;;  %v1484_v54 = vmul.f32 0.01, %v1430_v51  ;;  %vm1481_vm8 = vcmp.gt.f32.partialorder %v1476_v53, 0.0  ;;  %v1485_v55 = vmul.f32 0.01, %v1476_v53 }
 0xb85   :  { %v1488_v58 = vsel %vm1480_vm7, %v1430_v51, %v1484_v54  ;;  %v1489_v60 = vsel %vm1481_vm8, %v1476_v53, %v1485_v55 }
 0xb86   :  { %v1492_v62 = vadd.f32 %v1488_v58, %v1430_v51  ;;  %v1493_v1 = vadd.f32 %v1489_v60, %v1476_v53 }
 0xb88   :  { %1547 = vmatmul.f32.gmra.mxu1 %v1492_v62  ;;  %1683 = vmatmul.msk.f32.gmra.mxu0 %vm283_vm3, %v1493_v1 }
 0xbfd   :  { %v1545_v3 = vpop.f32.mrf.mxu1  ;;  %v1568_v4 = vpop.f32.mrf.mxu0 }
 0xbfe   :  { %v1546_v5 = vadd.f32 %v1730_v2, %v1545_v3 }
 0xc00   :  { %v1569_v6 = vadd.f32 %v1568_v4, %v1546_v5 }
 0xc02   :  { %1574 = vst [vmem:[#allocation16] sm:$0xff] %v1569_v6 }
 0xc05   :  { %v1548_v7 = vpop.f32.mrf.mxu1  ;;  %v1571_v9 = vpop.f32.mrf.mxu0 }
 0xc06   :  { %v1549_v36 = vadd.f32 %v1730_v2, %v1548_v7 }
 0xc08   :  { %v1572_v10 = vadd.f32 %v1571_v9, %v1549_v36 }
 0xc0a   :  { %1575 = vst [vmem:[#allocation16 + $0x8] sm:$0xff] %v1572_v10 }
 0xc0b   :  { %1588 = dma.vmem_to_hbm [thread:$0]  %s1581_s5, 256, %s1583_s16, [#allocation4], %s2024_s1, %s2024_s1, %s2025_s6  }
 0xc0c   :  { %2021 = dma.done.wait [#allocation4], 256  }
 0xc0d   :  { %2022 = vsyncadd [#allocation4], 4294967040 }
 0xc0e   :  { %1593 = vsyncpa [#allocation3], 1 }
 0xc0f   :  { %1594 = vsyncpa [#allocation6], 1 }
 0xc10   :  { %1595 = vsyncpa [#allocation9], 1 }
 0xc11   :  { %1596 = vsyncpa [#allocation12], 1 }
 0xc12   :  { %1597 = vsyncpa [#allocation15], 1 }
 0xc13   :  { %1598 = vsyncpa [#allocation4], 1 }

</bundles_post_ra>
